<compile_context>
chip_gen: v7x
topology: tpu7x:2x2x1
jax: 0.10.0
libtpu: 0.0.40
codegen_flags: <defaults>
</compile_context>

<pallas_src>
import jax
import jax.numpy as jnp
import numpy as np
from jax import lax
from jax.experimental import pallas as pl
from jax.experimental.pallas import tpu as pltpu


def encoder_kernel(x_ref, w_ih_ref, w_hh_ref, b_ref, w_fc_ref, b_fc_ref,
                   out_ref, gx_scr):
    """Full forward in one invocation.

    x_ref   : (T*B, V)    time-major, batch-flattened input
    w_ih_ref: (V, 4*Hp)   input->gates weights (transposed; gate order i|f|o|g,
                          each gate zero-padded to Hp columns)
    w_hh_ref: (Hp, 4*Hp)  hidden->gates weights (transposed, row+gate padded)
    b_ref   : (1, 4*Hp)   b_ih + b_hh (gate-padded)
    w_fc_ref: (Hp, E)     fc weight (transposed, row-padded)
    b_fc_ref: (1, E)      fc bias
    out_ref : (B, E)      normalized embedding
    gx_scr  : (T*B, 4*Hp) VMEM scratch for the hoisted input projection
    """
    TB = x_ref.shape[0]
    B = out_ref.shape[0]
    T = TB // B
    Hp = w_hh_ref.shape[0]

    # --- Prologue: hoisted input projection, one well-shaped MXU matmul ----
    gx_scr[...] = (
        jnp.dot(x_ref[...], w_ih_ref[...], preferred_element_type=jnp.float32)
        + b_ref[...]
    )

    w_hh = w_hh_ref[...]            # hoisted weight load (held across all steps)

    h0 = jnp.zeros((B, Hp), jnp.float32)
    c0 = jnp.zeros((B, Hp), jnp.float32)

    # --- Recurrence: per step only h @ W_hh + precomputed gates_x[t] --------
    def step(t, carry):
        h, c = carry
        row = pl.multiple_of(t * B, B)
        g_x = gx_scr[pl.ds(row, B), :]                          # (B, 4Hp)
        gates = g_x + jnp.dot(h, w_hh, preferred_element_type=jnp.float32)
        # Gate order (reordered in wrapper): [i | f | o | g], each a full
        # 128-lane block -> sigmoid in one contiguous slab, tanh on the last.
        ifo = jax.nn.sigmoid(gates[:, 0:3 * Hp])
        g_g = jnp.tanh(gates[:, 3 * Hp:4 * Hp])
        i_g = ifo[:, 0 * Hp:1 * Hp]
        f_g = ifo[:, 1 * Hp:2 * Hp]
        o_g = ifo[:, 2 * Hp:3 * Hp]
        c_new = f_g * c + i_g * g_g                             # padded lanes stay 0
        h_new = o_g * jnp.tanh(c_new)                           # padded lanes stay 0
        return h_new, c_new

    h, _ = lax.fori_loop(0, T, step, (h0, c0), unroll=True)

    # --- fc -> relu -> dropout(inference: identity) -> L2 normalize ---------
    # TODO(synk): training-mode dropout (p=0.3) omitted; inference semantics.
    z = jnp.dot(h, w_fc_ref[...], preferred_element_type=jnp.float32) + b_fc_ref[...]
    z = jnp.maximum(z, 0.0)
    sumsq = jnp.sum(z * z, axis=1, keepdims=True)
    inv_norm = lax.rsqrt(jnp.maximum(sumsq, 1e-24))   # == 1 / max(||z||, 1e-12)
    out_ref[...] = z * inv_norm


def encoder_forward(x, params, hidden_pad=128):
    """x: (B, T, V) float32 (batch_first, like PyTorch). Returns (B, E)."""
    w_ih, w_hh, b_ih, b_hh, w_fc, b_fc = params
    B, T, V = x.shape
    H = w_hh.shape[1]              # 64
    E = w_fc.shape[0]              # embedding_dim
    Hp = max(hidden_pad, H)        # pad hidden to a full 128-lane vreg

    # PyTorch gate-block order is [i, f, g, o]; reorder to [i, f, o, g] so the
    # three sigmoid gates are contiguous, then zero-pad each gate block to Hp.
    gate_perm = (0, 1, 3, 2)

    def reorder_pad_gate_cols(w):
        # (..., 4H) gate-blocked columns -> (..., 4Hp), reordered + padded.
        lead = w.shape[:-1]
        w4 = w.reshape(lead + (4, H))
        w4 = jnp.take(w4, jnp.array(gate_perm), axis=len(lead))
        w4 = jnp.pad(w4, [(0, 0)] * len(lead) + [(0, 0), (0, Hp - H)])
        return w4.reshape(lead + (4 * Hp,))

    x_flat = jnp.transpose(x, (1, 0, 2)).reshape(T * B, V)         # time-major, flat
    w_ih_p = reorder_pad_gate_cols(jnp.transpose(w_ih))            # (V, 4Hp)
    w_hh_p = reorder_pad_gate_cols(
        jnp.pad(jnp.transpose(w_hh), ((0, Hp - H), (0, 0))))       # (Hp, 4Hp)
    b_p = reorder_pad_gate_cols((b_ih + b_hh).reshape(1, 4 * H))   # (1, 4Hp)
    w_fc_p = jnp.pad(jnp.transpose(w_fc), ((0, Hp - H), (0, 0)))   # (Hp, E)
    b_fc_r = b_fc.reshape(1, E)                                    # (1, E)

    vmem = pl.BlockSpec(memory_space=pltpu.MemorySpace.VMEM)

    return pl.pallas_call(
        encoder_kernel,
        out_shape=jax.ShapeDtypeStruct((B, E), jnp.float32),
        in_specs=[vmem] * 6,
        out_specs=vmem,
        scratch_shapes=[
            pltpu.VMEM((T * B, 4 * Hp), jnp.float32),   # hoisted gates_x buffer
        ],
    )(x_flat, w_ih_p, w_hh_p, b_p, w_fc_p, b_fc_r)


def init_params(key, n_vars=2, hidden=64, embedding_dim=64):
    """Deterministic init matching PyTorch shapes (uniform +-1/sqrt(H))."""
    k = 1.0 / np.sqrt(hidden)
    ks = jax.random.split(key, 6)
    w_ih = jax.random.uniform(ks[0], (4 * hidden, n_vars), jnp.float32, -k, k)
    w_hh = jax.random.uniform(ks[1], (4 * hidden, hidden), jnp.float32, -k, k)
    b_ih = jax.random.uniform(ks[2], (4 * hidden,), jnp.float32, -k, k)
    b_hh = jax.random.uniform(ks[3], (4 * hidden,), jnp.float32, -k, k)
    kf = 1.0 / np.sqrt(hidden)
    w_fc = jax.random.uniform(ks[4], (embedding_dim, hidden), jnp.float32, -kf, kf)
    b_fc = jax.random.uniform(ks[5], (embedding_dim,), jnp.float32, -kf, kf)
    return (w_ih, w_hh, b_ih, b_hh, w_fc, b_fc)


def encoder_reference(x, params):
    """Pure-JAX reference of the PyTorch forward (inference mode)."""
    w_ih, w_hh, b_ih, b_hh, w_fc, b_fc = params
    B, T, V = x.shape
    H = w_hh.shape[1]
    h = jnp.zeros((B, H), jnp.float32)
    c = jnp.zeros((B, H), jnp.float32)

    def step(carry, x_t):
        h, c = carry
        gates = x_t @ w_ih.T + b_ih + h @ w_hh.T + b_hh
        i = jax.nn.sigmoid(gates[:, 0 * H:1 * H])
        f = jax.nn.sigmoid(gates[:, 1 * H:2 * H])
        g = jnp.tanh(gates[:, 2 * H:3 * H])
        o = jax.nn.sigmoid(gates[:, 3 * H:4 * H])
        c = f * c + i * g
        h = o * jnp.tanh(c)
        return (h, c), None

    (h, c), _ = lax.scan(step, (h, c), jnp.transpose(x, (1, 0, 2)))
    z = jnp.maximum(h @ w_fc.T + b_fc, 0.0)
    norm = jnp.sqrt(jnp.sum(z * z, axis=1, keepdims=True))
    return z / jnp.maximum(norm, 1e-12)


if __name__ == "__main__":
    B, T, V, H, E = 8, 16, 2, 64, 64
    key = jax.random.PRNGKey(0)
    k_x, k_p = jax.random.split(key)
    x = jax.random.normal(k_x, (B, T, V), jnp.float32)
    params = init_params(k_p, n_vars=V, hidden=H, embedding_dim=E)

    out = jax.block_until_ready(encoder_forward(x, params))

    ref = encoder_reference(x, params)
    assert out.shape == (B, E)
    np.testing.assert_allclose(np.asarray(out), np.asarray(ref), rtol=1e-5, atol=1e-5)
    print("KERNEL_OK")
</pallas_src>

<mosaic_0001>
module attributes {stable_mosaic.version = 11 : i64} {
  func.func @encoder_kernel(%arg0: memref<128x2xf32, #tpu.memory_space<vmem>>, %arg1: memref<2x512xf32, #tpu.memory_space<vmem>>, %arg2: memref<128x512xf32, #tpu.memory_space<vmem>>, %arg3: memref<1x512xf32, #tpu.memory_space<vmem>>, %arg4: memref<128x64xf32, #tpu.memory_space<vmem>>, %arg5: memref<1x64xf32, #tpu.memory_space<vmem>>, %arg6: memref<8x64xf32, #tpu.memory_space<vmem>>, %arg7: memref<128x512xf32, #tpu.memory_space<vmem>>) attributes {dimension_semantics = [], scalar_prefetch = 0 : i64, scratch_operands = 1 : i64, tpu.core_type = #tpu.core_type<tc>} {
    %c0 = arith.constant 0 : index
    %c0_0 = arith.constant 0 : index
    %0 = vector.load %arg0[%c0, %c0_0] : memref<128x2xf32, #tpu.memory_space<vmem>>, vector<128x2xf32>
    %c0_1 = arith.constant 0 : index
    %c0_2 = arith.constant 0 : index
    %1 = vector.load %arg1[%c0_1, %c0_2] : memref<2x512xf32, #tpu.memory_space<vmem>>, vector<2x512xf32>
    %cst = arith.constant dense<0.000000e+00> : vector<128x512xf32>
    %2 = tpu.matmul %0, %1, %cst {dimension_numbers = #tpu.dot_dimension_numbers<[1], [0], [0], [1], [0, 0, 1, 1], [], []>} : vector<128x2xf32>, vector<2x512xf32>, vector<128x512xf32> -> vector<128x512xf32>
    %c0_3 = arith.constant 0 : index
    %c0_4 = arith.constant 0 : index
    %3 = vector.load %arg3[%c0_3, %c0_4] : memref<1x512xf32, #tpu.memory_space<vmem>>, vector<1x512xf32>
    %4 = vector.broadcast %3 : vector<1x512xf32> to vector<128x512xf32>
    %5 = arith.addf %2, %4 : vector<128x512xf32>
    %c0_5 = arith.constant 0 : index
    %c0_6 = arith.constant 0 : index
    %6 = vector.load %arg7[%c0_5, %c0_6] : memref<128x512xf32, #tpu.memory_space<vmem>>, vector<128x512xf32>
    tpu.vector_store %arg7[%c0_5, %c0_6], %5 {strides = array<i32>} : memref<128x512xf32, #tpu.memory_space<vmem>>, vector<128x512xf32>,
    %c0_7 = arith.constant 0 : index
    %c0_8 = arith.constant 0 : index
    %7 = vector.load %arg2[%c0_7, %c0_8] : memref<128x512xf32, #tpu.memory_space<vmem>>, vector<128x512xf32>
    %cst_9 = arith.constant 0.000000e+00 : f32
    %8 = vector.broadcast %cst_9 : f32 to vector<8x128xf32>
    %cst_10 = arith.constant 0.000000e+00 : f32
    %9 = vector.broadcast %cst_10 : f32 to vector<8x128xf32>
    %c0_i32 = arith.constant 0 : i32
    %c8_i32 = arith.constant 8 : i32
    %10 = arith.muli %c0_i32, %c8_i32 : i32
    %11 = tpu.assume_multiple %10, 8 : i32
    %12 = arith.index_cast %11 : i32 to index
    %c0_11 = arith.constant 0 : index
    %13 = vector.load %arg7[%12, %c0_11] : memref<128x512xf32, #tpu.memory_space<vmem>>, vector<8x512xf32>
    %cst_12 = arith.constant dense<0.000000e+00> : vector<8x512xf32>
    %14 = tpu.matmul %8, %7, %cst_12 {dimension_numbers = #tpu.dot_dimension_numbers<[1], [0], [0], [1], [0, 0, 1, 1], [], []>} : vector<8x128xf32>, vector<128x512xf32>, vector<8x512xf32> -> vector<8x512xf32>
    %15 = arith.addf %13, %14 : vector<8x512xf32>
    %16 = vector.extract_strided_slice %15 {offsets = [0, 0], sizes = [8, 384], strides = [1, 1]} : vector<8x512xf32> to vector<8x384xf32>
    %17 = arith.negf %16 : vector<8x384xf32>
    %18 = math.exp %17 : vector<8x384xf32>
    %cst_13 = arith.constant 1.000000e+00 : f32
    %19 = vector.broadcast %cst_13 : f32 to vector<8x384xf32>
    %20 = arith.addf %19, %18 : vector<8x384xf32>
    %21 = arith.divf %19, %20 : vector<8x384xf32>
    %22 = vector.extract_strided_slice %15 {offsets = [0, 384], sizes = [8, 128], strides = [1, 1]} : vector<8x512xf32> to vector<8x128xf32>
    %23 = math.tanh %22 : vector<8x128xf32>
    %24 = vector.extract_strided_slice %21 {offsets = [0, 0], sizes = [8, 128], strides = [1, 1]} : vector<8x384xf32> to vector<8x128xf32>
    %25 = vector.extract_strided_slice %21 {offsets = [0, 128], sizes = [8, 128], strides = [1, 1]} : vector<8x384xf32> to vector<8x128xf32>
    %26 = vector.extract_strided_slice %21 {offsets = [0, 256], sizes = [8, 128], strides = [1, 1]} : vector<8x384xf32> to vector<8x128xf32>
    %27 = arith.mulf %25, %9 : vector<8x128xf32>
    %28 = arith.mulf %24, %23 : vector<8x128xf32>
    %29 = arith.addf %27, %28 : vector<8x128xf32>
    %30 = math.tanh %29 : vector<8x128xf32>
    %31 = arith.mulf %26, %30 : vector<8x128xf32>
    %c1_i32 = arith.constant 1 : i32
    %c8_i32_14 = arith.constant 8 : i32
    %32 = arith.muli %c1_i32, %c8_i32_14 : i32
    %33 = tpu.assume_multiple %32, 8 : i32
    %34 = arith.index_cast %33 : i32 to index
    %c0_15 = arith.constant 0 : index
    %35 = vector.load %arg7[%34, %c0_15] : memref<128x512xf32, #tpu.memory_space<vmem>>, vector<8x512xf32>
    %cst_16 = arith.constant dense<0.000000e+00> : vector<8x512xf32>
    %36 = tpu.matmul %31, %7, %cst_16 {dimension_numbers = #tpu.dot_dimension_numbers<[1], [0], [0], [1], [0, 0, 1, 1], [], []>} : vector<8x128xf32>, vector<128x512xf32>, vector<8x512xf32> -> vector<8x512xf32>
    %37 = arith.addf %35, %36 : vector<8x512xf32>
    %38 = vector.extract_strided_slice %37 {offsets = [0, 0], sizes = [8, 384], strides = [1, 1]} : vector<8x512xf32> to vector<8x384xf32>
    %39 = arith.negf %38 : vector<8x384xf32>
    %40 = math.exp %39 : vector<8x384xf32>
    %cst_17 = arith.constant 1.000000e+00 : f32
    %41 = vector.broadcast %cst_17 : f32 to vector<8x384xf32>
    %42 = arith.addf %41, %40 : vector<8x384xf32>
    %43 = arith.divf %41, %42 : vector<8x384xf32>
    %44 = vector.extract_strided_slice %37 {offsets = [0, 384], sizes = [8, 128], strides = [1, 1]} : vector<8x512xf32> to vector<8x128xf32>
    %45 = math.tanh %44 : vector<8x128xf32>
    %46 = vector.extract_strided_slice %43 {offsets = [0, 0], sizes = [8, 128], strides = [1, 1]} : vector<8x384xf32> to vector<8x128xf32>
    %47 = vector.extract_strided_slice %43 {offsets = [0, 128], sizes = [8, 128], strides = [1, 1]} : vector<8x384xf32> to vector<8x128xf32>
    %48 = vector.extract_strided_slice %43 {offsets = [0, 256], sizes = [8, 128], strides = [1, 1]} : vector<8x384xf32> to vector<8x128xf32>
    %49 = arith.mulf %47, %29 : vector<8x128xf32>
    %50 = arith.mulf %46, %45 : vector<8x128xf32>
    %51 = arith.addf %49, %50 : vector<8x128xf32>
    %52 = math.tanh %51 : vector<8x128xf32>
    %53 = arith.mulf %48, %52 : vector<8x128xf32>
    %c2_i32 = arith.constant 2 : i32
    %c8_i32_18 = arith.constant 8 : i32
    %54 = arith.muli %c2_i32, %c8_i32_18 : i32
    %55 = tpu.assume_multiple %54, 8 : i32
    %56 = arith.index_cast %55 : i32 to index
    %c0_19 = arith.constant 0 : index
    %57 = vector.load %arg7[%56, %c0_19] : memref<128x512xf32, #tpu.memory_space<vmem>>, vector<8x512xf32>
    %cst_20 = arith.constant dense<0.000000e+00> : vector<8x512xf32>
    %58 = tpu.matmul %53, %7, %cst_20 {dimension_numbers = #tpu.dot_dimension_numbers<[1], [0], [0], [1], [0, 0, 1, 1], [], []>} : vector<8x128xf32>, vector<128x512xf32>, vector<8x512xf32> -> vector<8x512xf32>
    %59 = arith.addf %57, %58 : vector<8x512xf32>
    %60 = vector.extract_strided_slice %59 {offsets = [0, 0], sizes = [8, 384], strides = [1, 1]} : vector<8x512xf32> to vector<8x384xf32>
    %61 = arith.negf %60 : vector<8x384xf32>
    %62 = math.exp %61 : vector<8x384xf32>
    %cst_21 = arith.constant 1.000000e+00 : f32
    %63 = vector.broadcast %cst_21 : f32 to vector<8x384xf32>
    %64 = arith.addf %63, %62 : vector<8x384xf32>
    %65 = arith.divf %63, %64 : vector<8x384xf32>
    %66 = vector.extract_strided_slice %59 {offsets = [0, 384], sizes = [8, 128], strides = [1, 1]} : vector<8x512xf32> to vector<8x128xf32>
    %67 = math.tanh %66 : vector<8x128xf32>
    %68 = vector.extract_strided_slice %65 {offsets = [0, 0], sizes = [8, 128], strides = [1, 1]} : vector<8x384xf32> to vector<8x128xf32>
    %69 = vector.extract_strided_slice %65 {offsets = [0, 128], sizes = [8, 128], strides = [1, 1]} : vector<8x384xf32> to vector<8x128xf32>
    %70 = vector.extract_strided_slice %65 {offsets = [0, 256], sizes = [8, 128], strides = [1, 1]} : vector<8x384xf32> to vector<8x128xf32>
    %71 = arith.mulf %69, %51 : vector<8x128xf32>
    %72 = arith.mulf %68, %67 : vector<8x128xf32>
    %73 = arith.addf %71, %72 : vector<8x128xf32>
    %74 = math.tanh %73 : vector<8x128xf32>
    %75 = arith.mulf %70, %74 : vector<8x128xf32>
    %c3_i32 = arith.constant 3 : i32
    %c8_i32_22 = arith.constant 8 : i32
    %76 = arith.muli %c3_i32, %c8_i32_22 : i32
    %77 = tpu.assume_multiple %76, 8 : i32
    %78 = arith.index_cast %77 : i32 to index
    %c0_23 = arith.constant 0 : index
    %79 = vector.load %arg7[%78, %c0_23] : memref<128x512xf32, #tpu.memory_space<vmem>>, vector<8x512xf32>
    %cst_24 = arith.constant dense<0.000000e+00> : vector<8x512xf32>
    %80 = tpu.matmul %75, %7, %cst_24 {dimension_numbers = #tpu.dot_dimension_numbers<[1], [0], [0], [1], [0, 0, 1, 1], [], []>} : vector<8x128xf32>, vector<128x512xf32>, vector<8x512xf32> -> vector<8x512xf32>
    %81 = arith.addf %79, %80 : vector<8x512xf32>
    %82 = vector.extract_strided_slice %81 {offsets = [0, 0], sizes = [8, 384], strides = [1, 1]} : vector<8x512xf32> to vector<8x384xf32>
    %83 = arith.negf %82 : vector<8x384xf32>
    %84 = math.exp %83 : vector<8x384xf32>
    %cst_25 = arith.constant 1.000000e+00 : f32
    %85 = vector.broadcast %cst_25 : f32 to vector<8x384xf32>
    %86 = arith.addf %85, %84 : vector<8x384xf32>
    %87 = arith.divf %85, %86 : vector<8x384xf32>
    %88 = vector.extract_strided_slice %81 {offsets = [0, 384], sizes = [8, 128], strides = [1, 1]} : vector<8x512xf32> to vector<8x128xf32>
    %89 = math.tanh %88 : vector<8x128xf32>
    %90 = vector.extract_strided_slice %87 {offsets = [0, 0], sizes = [8, 128], strides = [1, 1]} : vector<8x384xf32> to vector<8x128xf32>
    %91 = vector.extract_strided_slice %87 {offsets = [0, 128], sizes = [8, 128], strides = [1, 1]} : vector<8x384xf32> to vector<8x128xf32>
    %92 = vector.extract_strided_slice %87 {offsets = [0, 256], sizes = [8, 128], strides = [1, 1]} : vector<8x384xf32> to vector<8x128xf32>
    %93 = arith.mulf %91, %73 : vector<8x128xf32>
    %94 = arith.mulf %90, %89 : vector<8x128xf32>
    %95 = arith.addf %93, %94 : vector<8x128xf32>
    %96 = math.tanh %95 : vector<8x128xf32>
    %97 = arith.mulf %92, %96 : vector<8x128xf32>
    %c4_i32 = arith.constant 4 : i32
    %c8_i32_26 = arith.constant 8 : i32
    %98 = arith.muli %c4_i32, %c8_i32_26 : i32
    %99 = tpu.assume_multiple %98, 8 : i32
    %100 = arith.index_cast %99 : i32 to index
    %c0_27 = arith.constant 0 : index
    %101 = vector.load %arg7[%100, %c0_27] : memref<128x512xf32, #tpu.memory_space<vmem>>, vector<8x512xf32>
    %cst_28 = arith.constant dense<0.000000e+00> : vector<8x512xf32>
    %102 = tpu.matmul %97, %7, %cst_28 {dimension_numbers = #tpu.dot_dimension_numbers<[1], [0], [0], [1], [0, 0, 1, 1], [], []>} : vector<8x128xf32>, vector<128x512xf32>, vector<8x512xf32> -> vector<8x512xf32>
    %103 = arith.addf %101, %102 : vector<8x512xf32>
    %104 = vector.extract_strided_slice %103 {offsets = [0, 0], sizes = [8, 384], strides = [1, 1]} : vector<8x512xf32> to vector<8x384xf32>
    %105 = arith.negf %104 : vector<8x384xf32>
    %106 = math.exp %105 : vector<8x384xf32>
    %cst_29 = arith.constant 1.000000e+00 : f32
    %107 = vector.broadcast %cst_29 : f32 to vector<8x384xf32>
    %108 = arith.addf %107, %106 : vector<8x384xf32>
    %109 = arith.divf %107, %108 : vector<8x384xf32>
    %110 = vector.extract_strided_slice %103 {offsets = [0, 384], sizes = [8, 128], strides = [1, 1]} : vector<8x512xf32> to vector<8x128xf32>
    %111 = math.tanh %110 : vector<8x128xf32>
    %112 = vector.extract_strided_slice %109 {offsets = [0, 0], sizes = [8, 128], strides = [1, 1]} : vector<8x384xf32> to vector<8x128xf32>
    %113 = vector.extract_strided_slice %109 {offsets = [0, 128], sizes = [8, 128], strides = [1, 1]} : vector<8x384xf32> to vector<8x128xf32>
    %114 = vector.extract_strided_slice %109 {offsets = [0, 256], sizes = [8, 128], strides = [1, 1]} : vector<8x384xf32> to vector<8x128xf32>
    %115 = arith.mulf %113, %95 : vector<8x128xf32>
    %116 = arith.mulf %112, %111 : vector<8x128xf32>
    %117 = arith.addf %115, %116 : vector<8x128xf32>
    %118 = math.tanh %117 : vector<8x128xf32>
    %119 = arith.mulf %114, %118 : vector<8x128xf32>
    %c5_i32 = arith.constant 5 : i32
    %c8_i32_30 = arith.constant 8 : i32
    %120 = arith.muli %c5_i32, %c8_i32_30 : i32
    %121 = tpu.assume_multiple %120, 8 : i32
    %122 = arith.index_cast %121 : i32 to index
    %c0_31 = arith.constant 0 : index
    %123 = vector.load %arg7[%122, %c0_31] : memref<128x512xf32, #tpu.memory_space<vmem>>, vector<8x512xf32>
    %cst_32 = arith.constant dense<0.000000e+00> : vector<8x512xf32>
    %124 = tpu.matmul %119, %7, %cst_32 {dimension_numbers = #tpu.dot_dimension_numbers<[1], [0], [0], [1], [0, 0, 1, 1], [], []>} : vector<8x128xf32>, vector<128x512xf32>, vector<8x512xf32> -> vector<8x512xf32>
    %125 = arith.addf %123, %124 : vector<8x512xf32>
    %126 = vector.extract_strided_slice %125 {offsets = [0, 0], sizes = [8, 384], strides = [1, 1]} : vector<8x512xf32> to vector<8x384xf32>
    %127 = arith.negf %126 : vector<8x384xf32>
    %128 = math.exp %127 : vector<8x384xf32>
    %cst_33 = arith.constant 1.000000e+00 : f32
    %129 = vector.broadcast %cst_33 : f32 to vector<8x384xf32>
    %130 = arith.addf %129, %128 : vector<8x384xf32>
    %131 = arith.divf %129, %130 : vector<8x384xf32>
    %132 = vector.extract_strided_slice %125 {offsets = [0, 384], sizes = [8, 128], strides = [1, 1]} : vector<8x512xf32> to vector<8x128xf32>
    %133 = math.tanh %132 : vector<8x128xf32>
    %134 = vector.extract_strided_slice %131 {offsets = [0, 0], sizes = [8, 128], strides = [1, 1]} : vector<8x384xf32> to vector<8x128xf32>
    %135 = vector.extract_strided_slice %131 {offsets = [0, 128], sizes = [8, 128], strides = [1, 1]} : vector<8x384xf32> to vector<8x128xf32>
    %136 = vector.extract_strided_slice %131 {offsets = [0, 256], sizes = [8, 128], strides = [1, 1]} : vector<8x384xf32> to vector<8x128xf32>
    %137 = arith.mulf %135, %117 : vector<8x128xf32>
    %138 = arith.mulf %134, %133 : vector<8x128xf32>
    %139 = arith.addf %137, %138 : vector<8x128xf32>
    %140 = math.tanh %139 : vector<8x128xf32>
    %141 = arith.mulf %136, %140 : vector<8x128xf32>
    %c6_i32 = arith.constant 6 : i32
    %c8_i32_34 = arith.constant 8 : i32
    %142 = arith.muli %c6_i32, %c8_i32_34 : i32
    %143 = tpu.assume_multiple %142, 8 : i32
    %144 = arith.index_cast %143 : i32 to index
    %c0_35 = arith.constant 0 : index
    %145 = vector.load %arg7[%144, %c0_35] : memref<128x512xf32, #tpu.memory_space<vmem>>, vector<8x512xf32>
    %cst_36 = arith.constant dense<0.000000e+00> : vector<8x512xf32>
    %146 = tpu.matmul %141, %7, %cst_36 {dimension_numbers = #tpu.dot_dimension_numbers<[1], [0], [0], [1], [0, 0, 1, 1], [], []>} : vector<8x128xf32>, vector<128x512xf32>, vector<8x512xf32> -> vector<8x512xf32>
    %147 = arith.addf %145, %146 : vector<8x512xf32>
    %148 = vector.extract_strided_slice %147 {offsets = [0, 0], sizes = [8, 384], strides = [1, 1]} : vector<8x512xf32> to vector<8x384xf32>
    %149 = arith.negf %148 : vector<8x384xf32>
    %150 = math.exp %149 : vector<8x384xf32>
    %cst_37 = arith.constant 1.000000e+00 : f32
    %151 = vector.broadcast %cst_37 : f32 to vector<8x384xf32>
    %152 = arith.addf %151, %150 : vector<8x384xf32>
    %153 = arith.divf %151, %152 : vector<8x384xf32>
    %154 = vector.extract_strided_slice %147 {offsets = [0, 384], sizes = [8, 128], strides = [1, 1]} : vector<8x512xf32> to vector<8x128xf32>
    %155 = math.tanh %154 : vector<8x128xf32>
    %156 = vector.extract_strided_slice %153 {offsets = [0, 0], sizes = [8, 128], strides = [1, 1]} : vector<8x384xf32> to vector<8x128xf32>
    %157 = vector.extract_strided_slice %153 {offsets = [0, 128], sizes = [8, 128], strides = [1, 1]} : vector<8x384xf32> to vector<8x128xf32>
    %158 = vector.extract_strided_slice %153 {offsets = [0, 256], sizes = [8, 128], strides = [1, 1]} : vector<8x384xf32> to vector<8x128xf32>
    %159 = arith.mulf %157, %139 : vector<8x128xf32>
    %160 = arith.mulf %156, %155 : vector<8x128xf32>
    %161 = arith.addf %159, %160 : vector<8x128xf32>
    %162 = math.tanh %161 : vector<8x128xf32>
    %163 = arith.mulf %158, %162 : vector<8x128xf32>
    %c7_i32 = arith.constant 7 : i32
    %c8_i32_38 = arith.constant 8 : i32
    %164 = arith.muli %c7_i32, %c8_i32_38 : i32
    %165 = tpu.assume_multiple %164, 8 : i32
    %166 = arith.index_cast %165 : i32 to index
    %c0_39 = arith.constant 0 : index
    %167 = vector.load %arg7[%166, %c0_39] : memref<128x512xf32, #tpu.memory_space<vmem>>, vector<8x512xf32>
    %cst_40 = arith.constant dense<0.000000e+00> : vector<8x512xf32>
    %168 = tpu.matmul %163, %7, %cst_40 {dimension_numbers = #tpu.dot_dimension_numbers<[1], [0], [0], [1], [0, 0, 1, 1], [], []>} : vector<8x128xf32>, vector<128x512xf32>, vector<8x512xf32> -> vector<8x512xf32>
    %169 = arith.addf %167, %168 : vector<8x512xf32>
    %170 = vector.extract_strided_slice %169 {offsets = [0, 0], sizes = [8, 384], strides = [1, 1]} : vector<8x512xf32> to vector<8x384xf32>
    %171 = arith.negf %170 : vector<8x384xf32>
    %172 = math.exp %171 : vector<8x384xf32>
    %cst_41 = arith.constant 1.000000e+00 : f32
    %173 = vector.broadcast %cst_41 : f32 to vector<8x384xf32>
    %174 = arith.addf %173, %172 : vector<8x384xf32>
    %175 = arith.divf %173, %174 : vector<8x384xf32>
    %176 = vector.extract_strided_slice %169 {offsets = [0, 384], sizes = [8, 128], strides = [1, 1]} : vector<8x512xf32> to vector<8x128xf32>
    %177 = math.tanh %176 : vector<8x128xf32>
    %178 = vector.extract_strided_slice %175 {offsets = [0, 0], sizes = [8, 128], strides = [1, 1]} : vector<8x384xf32> to vector<8x128xf32>
    %179 = vector.extract_strided_slice %175 {offsets = [0, 128], sizes = [8, 128], strides = [1, 1]} : vector<8x384xf32> to vector<8x128xf32>
    %180 = vector.extract_strided_slice %175 {offsets = [0, 256], sizes = [8, 128], strides = [1, 1]} : vector<8x384xf32> to vector<8x128xf32>
    %181 = arith.mulf %179, %161 : vector<8x128xf32>
    %182 = arith.mulf %178, %177 : vector<8x128xf32>
    %183 = arith.addf %181, %182 : vector<8x128xf32>
    %184 = math.tanh %183 : vector<8x128xf32>
    %185 = arith.mulf %180, %184 : vector<8x128xf32>
    %c8_i32_42 = arith.constant 8 : i32
    %c8_i32_43 = arith.constant 8 : i32
    %186 = arith.muli %c8_i32_42, %c8_i32_43 : i32
    %187 = tpu.assume_multiple %186, 8 : i32
    %188 = arith.index_cast %187 : i32 to index
    %c0_44 = arith.constant 0 : index
    %189 = vector.load %arg7[%188, %c0_44] : memref<128x512xf32, #tpu.memory_space<vmem>>, vector<8x512xf32>
    %cst_45 = arith.constant dense<0.000000e+00> : vector<8x512xf32>
    %190 = tpu.matmul %185, %7, %cst_45 {dimension_numbers = #tpu.dot_dimension_numbers<[1], [0], [0], [1], [0, 0, 1, 1], [], []>} : vector<8x128xf32>, vector<128x512xf32>, vector<8x512xf32> -> vector<8x512xf32>
    %191 = arith.addf %189, %190 : vector<8x512xf32>
    %192 = vector.extract_strided_slice %191 {offsets = [0, 0], sizes = [8, 384], strides = [1, 1]} : vector<8x512xf32> to vector<8x384xf32>
    %193 = arith.negf %192 : vector<8x384xf32>
    %194 = math.exp %193 : vector<8x384xf32>
    %cst_46 = arith.constant 1.000000e+00 : f32
    %195 = vector.broadcast %cst_46 : f32 to vector<8x384xf32>
    %196 = arith.addf %195, %194 : vector<8x384xf32>
    %197 = arith.divf %195, %196 : vector<8x384xf32>
    %198 = vector.extract_strided_slice %191 {offsets = [0, 384], sizes = [8, 128], strides = [1, 1]} : vector<8x512xf32> to vector<8x128xf32>
    %199 = math.tanh %198 : vector<8x128xf32>
    %200 = vector.extract_strided_slice %197 {offsets = [0, 0], sizes = [8, 128], strides = [1, 1]} : vector<8x384xf32> to vector<8x128xf32>
    %201 = vector.extract_strided_slice %197 {offsets = [0, 128], sizes = [8, 128], strides = [1, 1]} : vector<8x384xf32> to vector<8x128xf32>
    %202 = vector.extract_strided_slice %197 {offsets = [0, 256], sizes = [8, 128], strides = [1, 1]} : vector<8x384xf32> to vector<8x128xf32>
    %203 = arith.mulf %201, %183 : vector<8x128xf32>
    %204 = arith.mulf %200, %199 : vector<8x128xf32>
    %205 = arith.addf %203, %204 : vector<8x128xf32>
    %206 = math.tanh %205 : vector<8x128xf32>
    %207 = arith.mulf %202, %206 : vector<8x128xf32>
    %c9_i32 = arith.constant 9 : i32
    %c8_i32_47 = arith.constant 8 : i32
    %208 = arith.muli %c9_i32, %c8_i32_47 : i32
    %209 = tpu.assume_multiple %208, 8 : i32
    %210 = arith.index_cast %209 : i32 to index
    %c0_48 = arith.constant 0 : index
    %211 = vector.load %arg7[%210, %c0_48] : memref<128x512xf32, #tpu.memory_space<vmem>>, vector<8x512xf32>
    %cst_49 = arith.constant dense<0.000000e+00> : vector<8x512xf32>
    %212 = tpu.matmul %207, %7, %cst_49 {dimension_numbers = #tpu.dot_dimension_numbers<[1], [0], [0], [1], [0, 0, 1, 1], [], []>} : vector<8x128xf32>, vector<128x512xf32>, vector<8x512xf32> -> vector<8x512xf32>
    %213 = arith.addf %211, %212 : vector<8x512xf32>
    %214 = vector.extract_strided_slice %213 {offsets = [0, 0], sizes = [8, 384], strides = [1, 1]} : vector<8x512xf32> to vector<8x384xf32>
    %215 = arith.negf %214 : vector<8x384xf32>
    %216 = math.exp %215 : vector<8x384xf32>
    %cst_50 = arith.constant 1.000000e+00 : f32
    %217 = vector.broadcast %cst_50 : f32 to vector<8x384xf32>
    %218 = arith.addf %217, %216 : vector<8x384xf32>
    %219 = arith.divf %217, %218 : vector<8x384xf32>
    %220 = vector.extract_strided_slice %213 {offsets = [0, 384], sizes = [8, 128], strides = [1, 1]} : vector<8x512xf32> to vector<8x128xf32>
    %221 = math.tanh %220 : vector<8x128xf32>
    %222 = vector.extract_strided_slice %219 {offsets = [0, 0], sizes = [8, 128], strides = [1, 1]} : vector<8x384xf32> to vector<8x128xf32>
    %223 = vector.extract_strided_slice %219 {offsets = [0, 128], sizes = [8, 128], strides = [1, 1]} : vector<8x384xf32> to vector<8x128xf32>
    %224 = vector.extract_strided_slice %219 {offsets = [0, 256], sizes = [8, 128], strides = [1, 1]} : vector<8x384xf32> to vector<8x128xf32>
    %225 = arith.mulf %223, %205 : vector<8x128xf32>
    %226 = arith.mulf %222, %221 : vector<8x128xf32>
    %227 = arith.addf %225, %226 : vector<8x128xf32>
    %228 = math.tanh %227 : vector<8x128xf32>
    %229 = arith.mulf %224, %228 : vector<8x128xf32>
    %c10_i32 = arith.constant 10 : i32
    %c8_i32_51 = arith.constant 8 : i32
    %230 = arith.muli %c10_i32, %c8_i32_51 : i32
    %231 = tpu.assume_multiple %230, 8 : i32
    %232 = arith.index_cast %231 : i32 to index
    %c0_52 = arith.constant 0 : index
    %233 = vector.load %arg7[%232, %c0_52] : memref<128x512xf32, #tpu.memory_space<vmem>>, vector<8x512xf32>
    %cst_53 = arith.constant dense<0.000000e+00> : vector<8x512xf32>
    %234 = tpu.matmul %229, %7, %cst_53 {dimension_numbers = #tpu.dot_dimension_numbers<[1], [0], [0], [1], [0, 0, 1, 1], [], []>} : vector<8x128xf32>, vector<128x512xf32>, vector<8x512xf32> -> vector<8x512xf32>
    %235 = arith.addf %233, %234 : vector<8x512xf32>
    %236 = vector.extract_strided_slice %235 {offsets = [0, 0], sizes = [8, 384], strides = [1, 1]} : vector<8x512xf32> to vector<8x384xf32>
    %237 = arith.negf %236 : vector<8x384xf32>
    %238 = math.exp %237 : vector<8x384xf32>
    %cst_54 = arith.constant 1.000000e+00 : f32
    %239 = vector.broadcast %cst_54 : f32 to vector<8x384xf32>
    %240 = arith.addf %239, %238 : vector<8x384xf32>
    %241 = arith.divf %239, %240 : vector<8x384xf32>
    %242 = vector.extract_strided_slice %235 {offsets = [0, 384], sizes = [8, 128], strides = [1, 1]} : vector<8x512xf32> to vector<8x128xf32>
    %243 = math.tanh %242 : vector<8x128xf32>
    %244 = vector.extract_strided_slice %241 {offsets = [0, 0], sizes = [8, 128], strides = [1, 1]} : vector<8x384xf32> to vector<8x128xf32>
    %245 = vector.extract_strided_slice %241 {offsets = [0, 128], sizes = [8, 128], strides = [1, 1]} : vector<8x384xf32> to vector<8x128xf32>
    %246 = vector.extract_strided_slice %241 {offsets = [0, 256], sizes = [8, 128], strides = [1, 1]} : vector<8x384xf32> to vector<8x128xf32>
    %247 = arith.mulf %245, %227 : vector<8x128xf32>
    %248 = arith.mulf %244, %243 : vector<8x128xf32>
    %249 = arith.addf %247, %248 : vector<8x128xf32>
    %250 = math.tanh %249 : vector<8x128xf32>
    %251 = arith.mulf %246, %250 : vector<8x128xf32>
    %c11_i32 = arith.constant 11 : i32
    %c8_i32_55 = arith.constant 8 : i32
    %252 = arith.muli %c11_i32, %c8_i32_55 : i32
    %253 = tpu.assume_multiple %252, 8 : i32
    %254 = arith.index_cast %253 : i32 to index
    %c0_56 = arith.constant 0 : index
    %255 = vector.load %arg7[%254, %c0_56] : memref<128x512xf32, #tpu.memory_space<vmem>>, vector<8x512xf32>
    %cst_57 = arith.constant dense<0.000000e+00> : vector<8x512xf32>
    %256 = tpu.matmul %251, %7, %cst_57 {dimension_numbers = #tpu.dot_dimension_numbers<[1], [0], [0], [1], [0, 0, 1, 1], [], []>} : vector<8x128xf32>, vector<128x512xf32>, vector<8x512xf32> -> vector<8x512xf32>
    %257 = arith.addf %255, %256 : vector<8x512xf32>
    %258 = vector.extract_strided_slice %257 {offsets = [0, 0], sizes = [8, 384], strides = [1, 1]} : vector<8x512xf32> to vector<8x384xf32>
    %259 = arith.negf %258 : vector<8x384xf32>
    %260 = math.exp %259 : vector<8x384xf32>
    %cst_58 = arith.constant 1.000000e+00 : f32
    %261 = vector.broadcast %cst_58 : f32 to vector<8x384xf32>
    %262 = arith.addf %261, %260 : vector<8x384xf32>
    %263 = arith.divf %261, %262 : vector<8x384xf32>
    %264 = vector.extract_strided_slice %257 {offsets = [0, 384], sizes = [8, 128], strides = [1, 1]} : vector<8x512xf32> to vector<8x128xf32>
    %265 = math.tanh %264 : vector<8x128xf32>
    %266 = vector.extract_strided_slice %263 {offsets = [0, 0], sizes = [8, 128], strides = [1, 1]} : vector<8x384xf32> to vector<8x128xf32>
    %267 = vector.extract_strided_slice %263 {offsets = [0, 128], sizes = [8, 128], strides = [1, 1]} : vector<8x384xf32> to vector<8x128xf32>
    %268 = vector.extract_strided_slice %263 {offsets = [0, 256], sizes = [8, 128], strides = [1, 1]} : vector<8x384xf32> to vector<8x128xf32>
    %269 = arith.mulf %267, %249 : vector<8x128xf32>
    %270 = arith.mulf %266, %265 : vector<8x128xf32>
    %271 = arith.addf %269, %270 : vector<8x128xf32>
    %272 = math.tanh %271 : vector<8x128xf32>
    %273 = arith.mulf %268, %272 : vector<8x128xf32>
    %c12_i32 = arith.constant 12 : i32
    %c8_i32_59 = arith.constant 8 : i32
    %274 = arith.muli %c12_i32, %c8_i32_59 : i32
    %275 = tpu.assume_multiple %274, 8 : i32
    %276 = arith.index_cast %275 : i32 to index
    %c0_60 = arith.constant 0 : index
    %277 = vector.load %arg7[%276, %c0_60] : memref<128x512xf32, #tpu.memory_space<vmem>>, vector<8x512xf32>
    %cst_61 = arith.constant dense<0.000000e+00> : vector<8x512xf32>
    %278 = tpu.matmul %273, %7, %cst_61 {dimension_numbers = #tpu.dot_dimension_numbers<[1], [0], [0], [1], [0, 0, 1, 1], [], []>} : vector<8x128xf32>, vector<128x512xf32>, vector<8x512xf32> -> vector<8x512xf32>
    %279 = arith.addf %277, %278 : vector<8x512xf32>
    %280 = vector.extract_strided_slice %279 {offsets = [0, 0], sizes = [8, 384], strides = [1, 1]} : vector<8x512xf32> to vector<8x384xf32>
    %281 = arith.negf %280 : vector<8x384xf32>
    %282 = math.exp %281 : vector<8x384xf32>
    %cst_62 = arith.constant 1.000000e+00 : f32
    %283 = vector.broadcast %cst_62 : f32 to vector<8x384xf32>
    %284 = arith.addf %283, %282 : vector<8x384xf32>
    %285 = arith.divf %283, %284 : vector<8x384xf32>
    %286 = vector.extract_strided_slice %279 {offsets = [0, 384], sizes = [8, 128], strides = [1, 1]} : vector<8x512xf32> to vector<8x128xf32>
    %287 = math.tanh %286 : vector<8x128xf32>
    %288 = vector.extract_strided_slice %285 {offsets = [0, 0], sizes = [8, 128], strides = [1, 1]} : vector<8x384xf32> to vector<8x128xf32>
    %289 = vector.extract_strided_slice %285 {offsets = [0, 128], sizes = [8, 128], strides = [1, 1]} : vector<8x384xf32> to vector<8x128xf32>
    %290 = vector.extract_strided_slice %285 {offsets = [0, 256], sizes = [8, 128], strides = [1, 1]} : vector<8x384xf32> to vector<8x128xf32>
    %291 = arith.mulf %289, %271 : vector<8x128xf32>
    %292 = arith.mulf %288, %287 : vector<8x128xf32>
    %293 = arith.addf %291, %292 : vector<8x128xf32>
    %294 = math.tanh %293 : vector<8x128xf32>
    %295 = arith.mulf %290, %294 : vector<8x128xf32>
    %c13_i32 = arith.constant 13 : i32
    %c8_i32_63 = arith.constant 8 : i32
    %296 = arith.muli %c13_i32, %c8_i32_63 : i32
    %297 = tpu.assume_multiple %296, 8 : i32
    %298 = arith.index_cast %297 : i32 to index
    %c0_64 = arith.constant 0 : index
    %299 = vector.load %arg7[%298, %c0_64] : memref<128x512xf32, #tpu.memory_space<vmem>>, vector<8x512xf32>
    %cst_65 = arith.constant dense<0.000000e+00> : vector<8x512xf32>
    %300 = tpu.matmul %295, %7, %cst_65 {dimension_numbers = #tpu.dot_dimension_numbers<[1], [0], [0], [1], [0, 0, 1, 1], [], []>} : vector<8x128xf32>, vector<128x512xf32>, vector<8x512xf32> -> vector<8x512xf32>
    %301 = arith.addf %299, %300 : vector<8x512xf32>
    %302 = vector.extract_strided_slice %301 {offsets = [0, 0], sizes = [8, 384], strides = [1, 1]} : vector<8x512xf32> to vector<8x384xf32>
    %303 = arith.negf %302 : vector<8x384xf32>
    %304 = math.exp %303 : vector<8x384xf32>
    %cst_66 = arith.constant 1.000000e+00 : f32
    %305 = vector.broadcast %cst_66 : f32 to vector<8x384xf32>
    %306 = arith.addf %305, %304 : vector<8x384xf32>
    %307 = arith.divf %305, %306 : vector<8x384xf32>
    %308 = vector.extract_strided_slice %301 {offsets = [0, 384], sizes = [8, 128], strides = [1, 1]} : vector<8x512xf32> to vector<8x128xf32>
    %309 = math.tanh %308 : vector<8x128xf32>
    %310 = vector.extract_strided_slice %307 {offsets = [0, 0], sizes = [8, 128], strides = [1, 1]} : vector<8x384xf32> to vector<8x128xf32>
    %311 = vector.extract_strided_slice %307 {offsets = [0, 128], sizes = [8, 128], strides = [1, 1]} : vector<8x384xf32> to vector<8x128xf32>
    %312 = vector.extract_strided_slice %307 {offsets = [0, 256], sizes = [8, 128], strides = [1, 1]} : vector<8x384xf32> to vector<8x128xf32>
    %313 = arith.mulf %311, %293 : vector<8x128xf32>
    %314 = arith.mulf %310, %309 : vector<8x128xf32>
    %315 = arith.addf %313, %314 : vector<8x128xf32>
    %316 = math.tanh %315 : vector<8x128xf32>
    %317 = arith.mulf %312, %316 : vector<8x128xf32>
    %c14_i32 = arith.constant 14 : i32
    %c8_i32_67 = arith.constant 8 : i32
    %318 = arith.muli %c14_i32, %c8_i32_67 : i32
    %319 = tpu.assume_multiple %318, 8 : i32
    %320 = arith.index_cast %319 : i32 to index
    %c0_68 = arith.constant 0 : index
    %321 = vector.load %arg7[%320, %c0_68] : memref<128x512xf32, #tpu.memory_space<vmem>>, vector<8x512xf32>
    %cst_69 = arith.constant dense<0.000000e+00> : vector<8x512xf32>
    %322 = tpu.matmul %317, %7, %cst_69 {dimension_numbers = #tpu.dot_dimension_numbers<[1], [0], [0], [1], [0, 0, 1, 1], [], []>} : vector<8x128xf32>, vector<128x512xf32>, vector<8x512xf32> -> vector<8x512xf32>
    %323 = arith.addf %321, %322 : vector<8x512xf32>
    %324 = vector.extract_strided_slice %323 {offsets = [0, 0], sizes = [8, 384], strides = [1, 1]} : vector<8x512xf32> to vector<8x384xf32>
    %325 = arith.negf %324 : vector<8x384xf32>
    %326 = math.exp %325 : vector<8x384xf32>
    %cst_70 = arith.constant 1.000000e+00 : f32
    %327 = vector.broadcast %cst_70 : f32 to vector<8x384xf32>
    %328 = arith.addf %327, %326 : vector<8x384xf32>
    %329 = arith.divf %327, %328 : vector<8x384xf32>
    %330 = vector.extract_strided_slice %323 {offsets = [0, 384], sizes = [8, 128], strides = [1, 1]} : vector<8x512xf32> to vector<8x128xf32>
    %331 = math.tanh %330 : vector<8x128xf32>
    %332 = vector.extract_strided_slice %329 {offsets = [0, 0], sizes = [8, 128], strides = [1, 1]} : vector<8x384xf32> to vector<8x128xf32>
    %333 = vector.extract_strided_slice %329 {offsets = [0, 128], sizes = [8, 128], strides = [1, 1]} : vector<8x384xf32> to vector<8x128xf32>
    %334 = vector.extract_strided_slice %329 {offsets = [0, 256], sizes = [8, 128], strides = [1, 1]} : vector<8x384xf32> to vector<8x128xf32>
    %335 = arith.mulf %333, %315 : vector<8x128xf32>
    %336 = arith.mulf %332, %331 : vector<8x128xf32>
    %337 = arith.addf %335, %336 : vector<8x128xf32>
    %338 = math.tanh %337 : vector<8x128xf32>
    %339 = arith.mulf %334, %338 : vector<8x128xf32>
    %c15_i32 = arith.constant 15 : i32
    %c8_i32_71 = arith.constant 8 : i32
    %340 = arith.muli %c15_i32, %c8_i32_71 : i32
    %341 = tpu.assume_multiple %340, 8 : i32
    %342 = arith.index_cast %341 : i32 to index
    %c0_72 = arith.constant 0 : index
    %343 = vector.load %arg7[%342, %c0_72] : memref<128x512xf32, #tpu.memory_space<vmem>>, vector<8x512xf32>
    %cst_73 = arith.constant dense<0.000000e+00> : vector<8x512xf32>
    %344 = tpu.matmul %339, %7, %cst_73 {dimension_numbers = #tpu.dot_dimension_numbers<[1], [0], [0], [1], [0, 0, 1, 1], [], []>} : vector<8x128xf32>, vector<128x512xf32>, vector<8x512xf32> -> vector<8x512xf32>
    %345 = arith.addf %343, %344 : vector<8x512xf32>
    %346 = vector.extract_strided_slice %345 {offsets = [0, 0], sizes = [8, 384], strides = [1, 1]} : vector<8x512xf32> to vector<8x384xf32>
    %347 = arith.negf %346 : vector<8x384xf32>
    %348 = math.exp %347 : vector<8x384xf32>
    %cst_74 = arith.constant 1.000000e+00 : f32
    %349 = vector.broadcast %cst_74 : f32 to vector<8x384xf32>
    %350 = arith.addf %349, %348 : vector<8x384xf32>
    %351 = arith.divf %349, %350 : vector<8x384xf32>
    %352 = vector.extract_strided_slice %345 {offsets = [0, 384], sizes = [8, 128], strides = [1, 1]} : vector<8x512xf32> to vector<8x128xf32>
    %353 = math.tanh %352 : vector<8x128xf32>
    %354 = vector.extract_strided_slice %351 {offsets = [0, 0], sizes = [8, 128], strides = [1, 1]} : vector<8x384xf32> to vector<8x128xf32>
    %355 = vector.extract_strided_slice %351 {offsets = [0, 128], sizes = [8, 128], strides = [1, 1]} : vector<8x384xf32> to vector<8x128xf32>
    %356 = vector.extract_strided_slice %351 {offsets = [0, 256], sizes = [8, 128], strides = [1, 1]} : vector<8x384xf32> to vector<8x128xf32>
    %357 = arith.mulf %355, %337 : vector<8x128xf32>
    %358 = arith.mulf %354, %353 : vector<8x128xf32>
    %359 = arith.addf %357, %358 : vector<8x128xf32>
    %360 = math.tanh %359 : vector<8x128xf32>
    %361 = arith.mulf %356, %360 : vector<8x128xf32>
    %c16_i32 = arith.constant 16 : i32
    %c0_75 = arith.constant 0 : index
    %c0_76 = arith.constant 0 : index
    %362 = vector.load %arg4[%c0_75, %c0_76] : memref<128x64xf32, #tpu.memory_space<vmem>>, vector<128x64xf32>
    %cst_77 = arith.constant dense<0.000000e+00> : vector<8x64xf32>
    %363 = tpu.matmul %361, %362, %cst_77 {dimension_numbers = #tpu.dot_dimension_numbers<[1], [0], [0], [1], [0, 0, 1, 1], [], []>} : vector<8x128xf32>, vector<128x64xf32>, vector<8x64xf32> -> vector<8x64xf32>
    %c0_78 = arith.constant 0 : index
    %c0_79 = arith.constant 0 : index
    %364 = vector.load %arg5[%c0_78, %c0_79] : memref<1x64xf32, #tpu.memory_space<vmem>>, vector<1x64xf32>
    %365 = vector.broadcast %364 : vector<1x64xf32> to vector<8x64xf32>
    %366 = arith.addf %363, %365 : vector<8x64xf32>
    %cst_80 = arith.constant 0.000000e+00 : f32
    %367 = vector.broadcast %cst_80 : f32 to vector<8x64xf32>
    %368 = arith.maximumf %366, %367 : vector<8x64xf32>
    %369 = arith.mulf %368, %368 : vector<8x64xf32>
    %cst_81 = arith.constant dense<0.000000e+00> : vector<8xf32>
    %370 = vector.multi_reduction <add>, %369, %cst_81 [1] : vector<8x64xf32> to vector<8xf32>
    %371 = vector.shape_cast %370 : vector<8xf32> to vector<8x1xf32>
    %cst_82 = arith.constant 1.000000e-24 : f32
    %372 = vector.broadcast %cst_82 : f32 to vector<8x1xf32>
    %373 = arith.maximumf %371, %372 : vector<8x1xf32>
    %374 = math.rsqrt %373 : vector<8x1xf32>
    %375 = vector.broadcast %374 : vector<8x1xf32> to vector<8x64xf32>
    %376 = arith.mulf %368, %375 : vector<8x64xf32>
    %c0_83 = arith.constant 0 : index
    %c0_84 = arith.constant 0 : index
    %377 = vector.load %arg6[%c0_83, %c0_84] : memref<8x64xf32, #tpu.memory_space<vmem>>, vector<8x64xf32>
    tpu.vector_store %arg6[%c0_83, %c0_84], %376 {strides = array<i32>} : memref<8x64xf32, #tpu.memory_space<vmem>>, vector<8x64xf32>,
    return
  }
}

</mosaic_0001>

<bundles_post_ra>
// kernel: tpu_custom_call.1
= control target key start
LH: loop header
LB: loop body
LE: loop exit
PB: predicated region body
PF: predicated region fallthrough
CT: control target
= control target key end

     0   :  { %11 = vsyncpa [#allocation4], 0  ;;  %s6262_s0 = inlined_call_operand.vmem [shape: f32[128,2], index: 0, kind: input, shape index: {}]   ;;  %s6263_s1 = inlined_call_operand.vmem [shape: f32[2,512], index: 1, kind: input, shape index: {}]   ;;  %s6264_s2 = inlined_call_operand.hbm [shape: f32[128,512], index: 2, kind: input, shape index: {}]   ;;  %s6265_s3 = inlined_call_operand.vmem [shape: f32[1,512], index: 3, kind: input, shape index: {}]   ;;  %s6266_s4 = inlined_call_operand.vmem [shape: f32[128,64], index: 4, kind: input, shape index: {}]   ;;  %s6267_s5 = inlined_call_operand.vmem [shape: f32[1,64], index: 5, kind: input, shape index: {}]   ;;  %s6268_s6 = inlined_call_operand.hbm [shape: f32[8,64], index: 6, kind: output, shape index: {}]  }
   0x1   :  { %12 = vsyncpa [#allocation5], 0  ;;  %s5198_s21 = smov [#allocation3]   ;;  %s5150_s25 = scalar_lea.hbm %s6264_s2, 8192 }
   0x2   :  { %s22_s22 = sshll.u32 %s5198_s21, 4  ;;  %p5151_p0 = scmp.ne.s32.totalorder %s6264_s2, %s5150_s25  ;;  %s23_s22 = int_to_ptr.vmem [resolvable:$true] %s22_s22 }
   0x3   :  { %p5154_p1 = scmp.lt.u32.totalorder %s5150_s25, %s6264_s2 }
   0x5   :  { %p5156_p2 = pnand %p5154_p1, %p5151_p0 }
   0x7   :  { %5159 = shalt.err (!%p5156_p2)
}
   0x8   :  { %s5160_s30 = scalar_lea.vmem %s23_s22, 8192  ;;  %p5165_p4 = scmp.lt.s32.totalorder %s23_s22, %s23_s22 }
   0x9   :  { %p5161_p3 = scmp.ne.s32.totalorder %s23_s22, %s5160_s30  ;;  %p5166_p5 = scmp.lt.s32.totalorder %s5160_s30, %s5160_s30 }
   0xb   :  { %p5167_p6 = por %p5166_p5, %p5165_p4 }
   0xd   :  { %p5168_p7 = pnand %p5167_p6, %p5161_p3 }
   0xf   :  { %5171 = shalt.err (!%p5168_p7)
}
  0x10   :  { %s5199_s7 = smov 512   ;;  %s5200_s8 = smov 32  }
  0x11   :  { %28 = dma.hbm_to_vmem [thread:$0]  %s6264_s2, 8192, %s23_s22, [#allocation4], %s5199_s7, %s5199_s7, %s5200_s8  }
  0x12   :  { %5194 = dma.done.wait [#allocation4], 8192  }
  0x13   :  { %5195 = vsyncadd [#allocation4], 4294959104  ;;  %v57_v0 = vlaneseq  ;;  %v5201_v1 = vmov 1983009808   ;;  %v5202_v3 = vmov 0.0   ;;  %v54_v7 = vld [vmem:[%s6263_s1] sm:$0xff] }
  0x14   :  { %v80_v2 = vunpack.c.l.s4 %v5201_v1  ;;  %217 = vmatprep.mubr.f32.mxu0 %v5202_v3  ;;  %289 = vmatprep.mubr.f32.mxu1 %v5202_v3  ;;  %v78_v8 = vcombine.high %v54_v7, %v54_v7  ;;  %vm144_vm0 = vcmask 1041408   ;;  %v540_v10 = vld [vmem:[#allocation3 + $0x8] sm:$0xff]  ;;  %v542_v14 = vld [vmem:[#allocation3 + $0x18] sm:$0xff]  ;;  %v5264_v16 = vld [vmem:[%s6262_s0] sm:$0xff]  ;;  %vm95_vm1 = vcmask 15360   ;;  %s5205_s22 = smov [#allocation6]  }
  0x15   :  { %v5255_v4 = vshrl.u32 %v57_v0, 7  ;;  %v544_v13 = vld [vmem:[#allocation3 + $0x28] sm:$0xff]  ;;  %v546_v15 = vld [vmem:[#allocation3 + $0x38] sm:$0xff]  ;;  %v5269_v17 = vld [vmem:[%s6262_s0 + $0x60] sm:$0xff]  ;;  %vm5204_vm2 = vmmov 0   ;;  %vm3530_vm3 = vcmask 523264  }
  0x16   :  { %v81_v5 = vunpack.c.0.s8 %v80_v2  ;;  %v5275_v19 = vpack.c.bf16 %v544_v13, %v540_v10  ;;  %v5277_v20 = vpack.c.bf16 %v546_v15, %v542_v14  ;;  %v539_v21 = vld [vmem:[#allocation3] sm:$0xff]  ;;  %v548_v23 = vld [vmem:[#allocation3 + $0x48] sm:$0xff]  ;;  %v5312_v33 = vld [vmem:[%s6262_s0 + $0x10] sm:$0xff]  ;;  %s3544_s23 = sshll.u32 %s5205_s22, 4  ;;  %s3545_s23 = int_to_ptr.vmem [resolvable:$true] %s3544_s23 }
  0x17   :  { %v543_v22 = vld [vmem:[#allocation3 + $0x20] sm:$0xff]  ;;  %v552_v24 = vld [vmem:[#allocation3 + $0x68] sm:$0xff]  ;;  %v5317_v34 = vld [vmem:[%s6262_s0 + $0x70] sm:$0xff]  ;;  %s5172_s24 = scalar_lea.vmem %s3545_s23, 128  ;;  %p5177_p9 = scmp.lt.s32.totalorder %s3545_s23, %s3545_s23 }
  0x18   :  { %v84_v6 = vsub.s32 %v81_v5, %v5255_v4  ;;  %v5288_v25 = vld [vmem:[%s6262_s0 + $0x8] sm:$0xff]  ;;  %v5297_v27 = vpack.c.bf16 %v543_v22, %v539_v21  ;;  %v5301_v28 = vpack.c.bf16 %v552_v24, %v548_v23  ;;  %v547_v29 = vld [vmem:[#allocation3 + $0x40] sm:$0xff]  ;;  %v5334_v41 = vld [vmem:[%s6262_s0 + $0x18] sm:$0xff]  ;;  %p5173_p8 = scmp.ne.s32.totalorder %s3545_s23, %s5172_s24  ;;  %p5178_p10 = scmp.lt.s32.totalorder %s5172_s24, %s5172_s24 }
  0x19   :  { %v5293_v26 = vld [vmem:[%s6262_s0 + $0x68] sm:$0xff]  ;;  %v551_v30 = vld [vmem:[#allocation3 + $0x60] sm:$0xff]  ;;  %v5339_v42 = vld [vmem:[%s6262_s0 + $0x78] sm:$0xff] }
  0x1a   :  { %v85_v9 = vrot.slane %v54_v7, %v84_v6  ;;  %v92_v12 = vrot.slane %v78_v8, %v84_v6  ;;  %v556_v31 = vld [vmem:[#allocation3 + $0x88] sm:$0xff]  ;;  %v5320_v35 = vpack.c.bf16 %v551_v30, %v547_v29  ;;  %v555_v37 = vld [vmem:[#allocation3 + $0x80] sm:$0xff]  ;;  %v541_v43 = vld [vmem:[#allocation3 + $0x10] sm:$0xff]  ;;  %p5179_p11 = por %p5178_p10, %p5177_p9 }
  0x1b   :  { %v560_v32 = vld [vmem:[#allocation3 + $0xa8] sm:$0xff]  ;;  %v559_v38 = vld [vmem:[#allocation3 + $0xa0] sm:$0xff]  ;;  %v545_v44 = vld [vmem:[#allocation3 + $0x30] sm:$0xff] }
  0x1c   :  { %v93_v11 = vcombine.high %v85_v9, %v85_v9  ;;  %v94_v18 = vcombine.high %v92_v12, %v92_v12  ;;  %v5323_v36 = vpack.c.bf16 %v560_v32, %v556_v31  ;;  %v564_v39 = vld [vmem:[#allocation3 + $0xc8] sm:$0xff]  ;;  %v5342_v45 = vpack.c.bf16 %v559_v38, %v555_v37  ;;  %v550_v46 = vld [vmem:[#allocation3 + $0x58] sm:$0xff]  ;;  %v563_v49 = vld [vmem:[#allocation3 + $0xc0] sm:$0xff]  ;;  %p5180_p12 = pnand %p5179_p11, %p5173_p8 }
  0x1d   :  { %v568_v40 = vld [vmem:[#allocation3 + $0xe8] sm:$0xff]  ;;  %v554_v47 = vld [vmem:[#allocation3 + $0x78] sm:$0xff]  ;;  %v567_v50 = vld [vmem:[#allocation3 + $0xe0] sm:$0xff]  ;;  %v5358_v52 = vpack.c.bf16 %v545_v44, %v541_v43 }
  0x1e   :  { %3568 = vmatprep.subr.msk.mxu0 %vm144_vm0, %v93_v11  ;;  %4753 = vmatprep.subr.msk.mxu1 %vm144_vm0, %v93_v11  ;;  %v5345_v48 = vpack.c.bf16 %v568_v40, %v564_v39  ;;  %v5356_v51 = vld [vmem:[%s6262_s0 + $0x20] sm:$0xff]  ;;  %v5360_v53 = vpack.c.bf16 %v554_v47, %v550_v46  ;;  %v549_v54 = vld [vmem:[#allocation3 + $0x50] sm:$0xff]  ;;  %v5364_v56 = vpack.c.bf16 %v567_v50, %v563_v49  ;;  %v572_v57 = vld [vmem:[#allocation3 + $0x108] sm:$0xff] }
  0x1f   :  { %3569 = vmatpush1.msk.msra.mxu0 %vm144_vm0, %v85_v9  ;;  %4754 = vmatpush1.msk.msra.mxu1 %vm144_vm0, %v85_v9  ;;  %v553_v55 = vld [vmem:[#allocation3 + $0x70] sm:$0xff]  ;;  %v576_v58 = vld [vmem:[#allocation3 + $0x128] sm:$0xff]  ;;  %v558_v59 = vld [vmem:[#allocation3 + $0x98] sm:$0xff] }
  0x20   :  { %3570 = vmatmul.mubr.msk.f32.vlgmr.msra.gmra.mrb[0].mxu0 %vm95_vm1, %v5264_v16  ;;  %3582 = vmatmul.mubr.msk.f32.vlgmr.msra.gmra.mrb[0].mxu1 %vm95_vm1, %v5269_v17  ;;  %v562_v60 = vld [vmem:[#allocation3 + $0xb8] sm:$0xff]  ;;  %v571_v61 = vld [vmem:[#allocation3 + $0x100] sm:$0xff]  ;;  %v5375_v63 = vld [vmem:[%s6262_s0 + $0x28] sm:$0xff]  ;;  %v5379_v0 = vpack.c.bf16 %v553_v55, %v549_v54  ;;  %v5381_v1 = vpack.c.bf16 %v576_v58, %v572_v57 }
  0x21   :  { %3586 = vmatprep.subr.msk.mxu1 %vm144_vm0, %v94_v18  ;;  %223 = vmatprep.mubr.f32.mxu0 %v5202_v3  ;;  %v575_v62 = vld [vmem:[#allocation3 + $0x120] sm:$0xff]  ;;  %v557_v2 = vld [vmem:[#allocation3 + $0x90] sm:$0xff]  ;;  %v5384_v6 = vpack.c.bf16 %v562_v60, %v558_v59  ;;  %v580_v8 = vld [vmem:[#allocation3 + $0x148] sm:$0xff] }
  0x22   :  { %3587 = vmatpush1.msk.msra.mxu1 %vm144_vm0, %v92_v12  ;;  %295 = vmatprep.mubr.f32.mxu1 %v5202_v3  ;;  %v561_v5 = vld [vmem:[#allocation3 + $0xb0] sm:$0xff]  ;;  %v5386_v7 = vpack.c.bf16 %v575_v62, %v571_v61  ;;  %v584_v9 = vld [vmem:[#allocation3 + $0x168] sm:$0xff]  ;;  %v579_v10 = vld [vmem:[#allocation3 + $0x140] sm:$0xff] }
  0x23   :  { %3706 = vmatprep.subr.bf16.mxu0 %v5275_v19  ;;  %3738 = vmatprep.subr.bf16.mxu1 %v5277_v20  ;;  %v583_v11 = vld [vmem:[#allocation3 + $0x160] sm:$0xff]  ;;  %v566_v12 = vld [vmem:[#allocation3 + $0xd8] sm:$0xff]  ;;  %v5397_v14 = vld [vmem:[%s6262_s0 + $0x30] sm:$0xff]  ;;  %v5401_v15 = vpack.c.bf16 %v561_v5, %v557_v2 }
  0x24   :  { %3571 = vmatmul.mubr.msk.f32.gmra.mrb[2].mxu0 %vm95_vm1, %v5288_v25  ;;  %3583 = vmatmul.mubr.msk.f32.gmra.mrb[2].mxu1 %vm95_vm1, %v5293_v26  ;;  %v570_v13 = vld [vmem:[#allocation3 + $0xf8] sm:$0xff]  ;;  %v588_v18 = vld [vmem:[#allocation3 + $0x188] sm:$0xff]  ;;  %v5407_v22 = vpack.c.bf16 %v583_v11, %v579_v10  ;;  %v587_v24 = vld [vmem:[#allocation3 + $0x180] sm:$0xff] }
  0x25   :  { %229 = vmatprep.mubr.f32.mxu0 %v5202_v3  ;;  %301 = vmatprep.mubr.f32.mxu1 %v5202_v3  ;;  %v592_v21 = vld [vmem:[#allocation3 + $0x1a8] sm:$0xff]  ;;  %v5409_v23 = vpack.c.bf16 %v570_v13, %v566_v12  ;;  %v569_v29 = vld [vmem:[#allocation3 + $0xf0] sm:$0xff]  ;;  %v591_v30 = vld [vmem:[#allocation3 + $0x1a0] sm:$0xff] }
  0x26   :  { %3708 = vmatpush1.bf16.msra.mxu0 %v5297_v27  ;;  %v574_v31 = vld [vmem:[#allocation3 + $0x118] sm:$0xff]  ;;  %v5424_v38 = vpack.c.bf16 %v592_v21, %v588_v18  ;;  %v600_v40 = vld [vmem:[#allocation3 + $0x1e8] sm:$0xff]  ;;  %v5430_v43 = vpack.c.bf16 %v591_v30, %v587_v24  ;;  %v595_v44 = vld [vmem:[#allocation3 + $0x1c0] sm:$0xff] }
  0x27   :  { %3710 = vmatprep.subr.bf16.mxu0 %v5301_v28  ;;  %v578_v32 = vld [vmem:[#allocation3 + $0x138] sm:$0xff]  ;;  %v573_v47 = vld [vmem:[#allocation3 + $0x110] sm:$0xff]  ;;  %v599_v50 = vld [vmem:[#allocation3 + $0x1e0] sm:$0xff] }
  0x28   :  { %3572 = vmatmul.mubr.msk.f32.gmra.mrb[4].mxu0 %vm95_vm1, %v5312_v33  ;;  %3584 = vmatmul.mubr.msk.f32.gmra.mrb[4].mxu1 %vm95_vm1, %v5317_v34  ;;  %v5420_v37 = vld [vmem:[%s6262_s0 + $0x38] sm:$0xff]  ;;  %v5432_v46 = vpack.c.bf16 %v578_v32, %v574_v31  ;;  %v577_v49 = vld [vmem:[#allocation3 + $0x130] sm:$0xff]  ;;  %v46_v57 = vld [vmem:[%s6262_s0 + $0x40] sm:$0xff] }
  0x29   :  { %235 = vmatprep.mubr.f32.mxu0 %v5202_v3  ;;  %307 = vmatprep.mubr.f32.mxu1 %v5202_v3  ;;  %v582_v54 = vld [vmem:[#allocation3 + $0x158] sm:$0xff]  ;;  %v5447_v59 = vpack.c.bf16 %v577_v49, %v573_v47  ;;  %v581_v61 = vld [vmem:[#allocation3 + $0x150] sm:$0xff]  ;;  %v55_v47 = vld [vmem:[%s6265_s3] sm:$0xf]  ;;  %v59_v49 = vsub.s32 0, %v5255_v4 }
  0x2a   :  { %3712 = vmatpush1.bf16.msra.mxu0 %v5320_v35  ;;  %v586_v55 = vld [vmem:[#allocation3 + $0x178] sm:$0xff]  ;;  %v585_v62 = vld [vmem:[#allocation3 + $0x170] sm:$0xff] }
  0x2b   :  { %3714 = vmatprep.subr.bf16.mxu0 %v5323_v36  ;;  %v5453_v60 = vpack.c.bf16 %v586_v55, %v582_v54  ;;  %v590_v2 = vld [vmem:[#allocation3 + $0x198] sm:$0xff]  ;;  %v589_v10 = vld [vmem:[#allocation3 + $0x190] sm:$0xff]  ;;  %v5584_v54 = vrot.slane %v55_v47, %v59_v49 }
  0x2c   :  { %3573 = vmatmul.mubr.msk.f32.gmra.mrb[6].mxu0 %vm95_vm1, %v5334_v41  ;;  %3585 = vmatmul.mubr.msk.f32.gmra.mrb[6].mxu1 %vm95_vm1, %v5339_v42  ;;  %v594_v5 = vld [vmem:[#allocation3 + $0x1b8] sm:$0xff]  ;;  %v593_v11 = vld [vmem:[#allocation3 + $0x1b0] sm:$0xff] }
  0x2d   :  { %241 = vmatprep.mubr.f32.mxu0 %v5202_v3  ;;  %378 = vmatprep.mubr.f32.mxu1 %v5202_v3  ;;  %v598_v12 = vld [vmem:[#allocation3 + $0x1d8] sm:$0xff]  ;;  %v48_v18 = vld [vmem:[%s6262_s0 + $0x50] sm:$0xff]  ;;  %v5480_v21 = vpack.c.bf16 %v593_v11, %v589_v10 }
  0x2e   :  { %3716 = vmatpush1.bf16.msra.mxu0 %v5342_v45  ;;  %v602_v13 = vld [vmem:[#allocation3 + $0x1f8] sm:$0xff] }
  0x2f   :  { %3718 = vmatprep.subr.bf16.mxu0 %v5345_v48  ;;  %v5484_v24 = vpack.c.bf16 %v602_v13, %v598_v12 }
  0x30   :  { %3574 = vmatmul.mubr.msk.f32.gmra.mrb[8].mxu0 %vm95_vm1, %v5356_v51  ;;  %3588 = vmatmul.mubr.msk.f32.vlgmr.msra.gmra.mrb[8].mxu1 %vm95_vm1, %v5264_v16  ;;  %v5403_v16 = vpack.c.bf16 %v584_v9, %v580_v8  ;;  %v47_v8 = vld [vmem:[%s6262_s0 + $0x48] sm:$0xff]  ;;  %v5465_v9 = vpack.c.bf16 %v585_v62, %v581_v61 }
  0x31   :  { %3740 = vmatpush1.bf16.msra.mxu1 %v5358_v52  ;;  %247 = vmatprep.mubr.f32.mxu0 %v5202_v3 }
  0x32   :  { %384 = vmatprep.mubr.f32.mxu1 %v5202_v3  ;;  %3742 = vmatprep.subr.bf16.mxu1 %v5360_v53 }
  0x33   :  { %3720 = vmatpush1.bf16.msra.mxu0 %v5364_v56 }
  0x34   :  { %3575 = vmatmul.mubr.msk.f32.gmra.mrb[10].mxu0 %vm95_vm1, %v5375_v63  ;;  %3589 = vmatmul.mubr.msk.f32.gmra.mrb[10].mxu1 %vm95_vm1, %v5288_v25  ;;  %v565_v25 = vld [vmem:[#allocation3 + $0xd0] sm:$0xff] }
  0x35   :  { %253 = vmatprep.mubr.f32.mxu0 %v5202_v3  ;;  %390 = vmatprep.mubr.f32.mxu1 %v5202_v3  ;;  %v5426_v39 = vpack.c.bf16 %v569_v29, %v565_v25  ;;  %v601_v25 = vld [vmem:[#allocation3 + $0x1f0] sm:$0xff]  ;;  %v49_v29 = vld [vmem:[%s6262_s0 + $0x58] sm:$0xff] }
  0x36   :  { %3744 = vmatpush1.bf16.msra.mxu1 %v5379_v0  ;;  %3722 = vmatprep.subr.bf16.mxu0 %v5381_v1 }
  0x37   :  { %3746 = vmatprep.subr.bf16.mxu1 %v5384_v6  ;;  %3724 = vmatpush1.bf16.msra.mxu0 %v5386_v7 }
  0x38   :  { %3576 = vmatmul.mubr.msk.f32.gmra.mrb[12].mxu0 %vm95_vm1, %v5397_v14  ;;  %3590 = vmatmul.mubr.msk.f32.gmra.mrb[12].mxu1 %vm95_vm1, %v5312_v33  ;;  %v596_v33 = vld [vmem:[#allocation3 + $0x1c8] sm:$0xff] }
  0x39   :  { %259 = vmatprep.mubr.f32.mxu0 %v5202_v3  ;;  %396 = vmatprep.mubr.f32.mxu1 %v5202_v3  ;;  %v5445_v58 = vpack.c.bf16 %v600_v40, %v596_v33 }
  0x3a   :  { %3748 = vmatpush1.bf16.msra.mxu1 %v5401_v15  ;;  %3726 = vmatprep.subr.bf16.mxu0 %v5403_v16 }
  0x3b   :  { %3728 = vmatpush1.bf16.msra.mxu0 %v5407_v22  ;;  %3750 = vmatprep.subr.bf16.mxu1 %v5409_v23 }
  0x3c   :  { %3577 = vmatmul.mubr.msk.f32.gmra.mrb[14].mxu0 %vm95_vm1, %v5420_v37  ;;  %3591 = vmatmul.mubr.msk.f32.gmra.mrb[14].mxu1 %vm95_vm1, %v5334_v41  ;;  %v5450_v41 = vpack.c.bf16 %v599_v50, %v595_v44  ;;  %v63_v44 = vsub.s32 1, %v5255_v4 }
  0x3d   :  { %265 = vmatprep.mubr.f32.mxu0 %v5202_v3  ;;  %402 = vmatprep.mubr.f32.mxu1 %v5202_v3 }
  0x3e   :  { %3730 = vmatprep.subr.bf16.mxu0 %v5424_v38  ;;  %3752 = vmatpush1.bf16.msra.mxu1 %v5426_v39  ;;  %v5582_v50 = vrot.slane %v55_v47, %v63_v44 }
  0x3f   :  { %3732 = vmatpush1.bf16.msra.mxu0 %v5430_v43  ;;  %3754 = vmatprep.subr.bf16.mxu1 %v5432_v46 }
  0x40   :  { %3578 = vmatmul.mubr.msk.f32.gmra.mrb[16].mxu0 %vm95_vm1, %v46_v57  ;;  %3592 = vmatmul.mubr.msk.f32.gmra.mrb[16].mxu1 %vm95_vm1, %v5356_v51  ;;  %v5469_v51 = vpack.c.bf16 %v594_v5, %v590_v2  ;;  %v67_v2 = vsub.s32 2, %v5255_v4  ;;  %v71_v5 = vsub.s32 3, %v5255_v4 }
  0x41   :  { %271 = vmatprep.mubr.f32.mxu0 %v5202_v3  ;;  %408 = vmatprep.mubr.f32.mxu1 %v5202_v3 }
  0x42   :  { %3734 = vmatprep.subr.bf16.mxu0 %v5445_v58  ;;  %3756 = vmatpush1.bf16.msra.mxu1 %v5447_v59  ;;  %v5590_v11 = vrot.slane %v55_v47, %v67_v2  ;;  %v5592_v12 = vrot.slane %v55_v47, %v71_v5 }
  0x43   :  { %3736 = vmatpush1.bf16.msra.mxu0 %v5450_v41  ;;  %3758 = vmatprep.subr.bf16.mxu1 %v5453_v60 }
  0x44   :  { %3579 = vmatmul.mubr.msk.f32.gmra.mrb[18].mxu0 %vm95_vm1, %v47_v8  ;;  %3593 = vmatmul.mubr.msk.f32.gmra.mrb[18].mxu1 %vm95_vm1, %v5375_v63  ;;  %v597_v63 = vld [vmem:[#allocation3 + $0x1d0] sm:$0xff] }
  0x45   :  { %277 = vmatprep.mubr.f32.mxu0 %v5202_v3  ;;  %414 = vmatprep.mubr.f32.mxu1 %v5202_v3  ;;  %v5495_v30 = vpack.c.bf16 %v601_v25, %v597_v63 }
  0x46   :  { %3760 = vmatpush1.bf16.msra.mxu1 %v5465_v9  ;;  %3770 = vmatprep.subr.bf16.mxu0 %v5275_v19 }
  0x47   :  { %3762 = vmatprep.subr.bf16.mxu1 %v5469_v51 }
  0x48   :  { %3580 = vmatmul.mubr.msk.f32.gmra.mrb[20].mxu0 %vm95_vm1, %v48_v18  ;;  %3594 = vmatmul.mubr.msk.f32.gmra.mrb[20].mxu1 %vm95_vm1, %v5397_v14 }
  0x49   :  { %283 = vmatprep.mubr.f32.mxu0 %v5202_v3  ;;  %420 = vmatprep.mubr.f32.mxu1 %v5202_v3 }
  0x4a   :  { %3764 = vmatpush1.bf16.msra.mxu1 %v5480_v21 }
  0x4b   :  { %3766 = vmatprep.subr.bf16.mxu1 %v5484_v24 }
  0x4c   :  { %3581 = vmatmul.mubr.msk.f32.gmra.mrb[22].mxu0 %vm95_vm1, %v49_v29  ;;  %3595 = vmatmul.mubr.msk.f32.gmra.mrb[22].mxu1 %vm95_vm1, %v5420_v37 }
  0x4d   :  { %426 = vmatprep.mubr.f32.mxu1 %v5202_v3  ;;  %674 = vmatprep.mubr.f32.mxu0 %v5202_v3 }
  0x4e   :  { %3768 = vmatpush1.bf16.msra.mxu1 %v5495_v30 }
  0x4f   :  { %3802 = vmatprep.subr.bf16.mxu1 %v5277_v20 }
  0x50   :  { %3596 = vmatmul.mubr.msk.f32.gmra.mrb[24].mxu1 %vm95_vm1, %v46_v57  ;;  %675 = vmatmul.mubr.f32.vlgmr.msra.gmra.mrb[0].mxu0 %v5202_v3 }
  0x51   :  { %432 = vmatprep.mubr.f32.mxu1 %v5202_v3  ;;  %3772 = vmatpush1.bf16.msra.mxu0 %v5297_v27 }
  0x52   :  { %3774 = vmatprep.subr.bf16.mxu0 %v5301_v28  ;;  %851 = vmatprep.mubr.f32.mxu0 %v5202_v3 }
  0x54   :  { %3597 = vmatmul.mubr.msk.f32.gmra.mrb[26].mxu1 %vm95_vm1, %v47_v8 }
  0x55   :  { %438 = vmatprep.mubr.f32.mxu1 %v5202_v3  ;;  %3776 = vmatpush1.bf16.msra.mxu0 %v5320_v35 }
  0x56   :  { %3778 = vmatprep.subr.bf16.mxu0 %v5323_v36 }
  0x58   :  { %3598 = vmatmul.mubr.msk.f32.gmra.mrb[28].mxu1 %vm95_vm1, %v48_v18 }
  0x59   :  { %444 = vmatprep.mubr.f32.mxu1 %v5202_v3  ;;  %3780 = vmatpush1.bf16.msra.mxu0 %v5342_v45 }
  0x5a   :  { %3782 = vmatprep.subr.bf16.mxu0 %v5345_v48 }
  0x5c   :  { %3599 = vmatmul.mubr.msk.f32.gmra.mrb[30].mxu1 %vm95_vm1, %v49_v29 }
  0x5d   :  { %450 = vmatprep.mubr.f32.mxu1 %v5202_v3  ;;  %3784 = vmatpush1.bf16.msra.mxu0 %v5364_v56 }
  0x5e   :  { %3786 = vmatprep.subr.bf16.mxu0 %v5381_v1 }
  0x60   :  { %3600 = vmatmul.mubr.msk.f32.gmra.mrb[32].mxu1 %vm95_vm1, %v5269_v17 }
  0x61   :  { %456 = vmatprep.mubr.f32.mxu1 %v5202_v3  ;;  %3788 = vmatpush1.bf16.msra.mxu0 %v5386_v7 }
  0x62   :  { %3790 = vmatprep.subr.bf16.mxu0 %v5403_v16 }
  0x64   :  { %3601 = vmatmul.mubr.msk.f32.gmra.mrb[34].mxu1 %vm95_vm1, %v5293_v26 }
  0x65   :  { %462 = vmatprep.mubr.f32.mxu1 %v5202_v3  ;;  %3792 = vmatpush1.bf16.msra.mxu0 %v5407_v22 }
  0x66   :  { %3794 = vmatprep.subr.bf16.mxu0 %v5424_v38 }
  0x68   :  { %3602 = vmatmul.mubr.msk.f32.gmra.mrb[36].mxu1 %vm95_vm1, %v5317_v34 }
  0x69   :  { %468 = vmatprep.mubr.f32.mxu1 %v5202_v3  ;;  %3796 = vmatpush1.bf16.msra.mxu0 %v5430_v43 }
  0x6a   :  { %3798 = vmatprep.subr.bf16.mxu0 %v5445_v58 }
  0x6c   :  { %3603 = vmatmul.mubr.msk.f32.gmra.mrb[38].mxu1 %vm95_vm1, %v5339_v42 }
  0x6d   :  { %745 = vmatprep.mubr.f32.mxu1 %v5202_v3  ;;  %3800 = vmatpush1.bf16.msra.mxu0 %v5450_v41 }
  0x6e   :  { %3834 = vmatprep.subr.bf16.mxu0 %v5275_v19 }
  0x70   :  { %746 = vmatmul.mubr.f32.vlgmr.msra.gmra.mrb[8].mxu1 %v5202_v3 }
  0x71   :  { %3804 = vmatpush1.bf16.msra.mxu1 %v5358_v52  ;;  %922 = vmatprep.mubr.f32.mxu1 %v5202_v3 }
  0x72   :  { %3806 = vmatprep.subr.bf16.mxu1 %v5360_v53 }
  0x75   :  { %3808 = vmatpush1.bf16.msra.mxu1 %v5379_v0 }
  0x76   :  { %3810 = vmatprep.subr.bf16.mxu1 %v5384_v6 }
  0x79   :  { %3812 = vmatpush1.bf16.msra.mxu1 %v5401_v15 }
  0x7a   :  { %3814 = vmatprep.subr.bf16.mxu1 %v5409_v23 }
  0x7d   :  { %3816 = vmatpush1.bf16.msra.mxu1 %v5426_v39 }
  0x7e   :  { %3818 = vmatprep.subr.bf16.mxu1 %v5432_v46 }
  0x81   :  { %3820 = vmatpush1.bf16.msra.mxu1 %v5447_v59 }
  0x82   :  { %3822 = vmatprep.subr.bf16.mxu1 %v5453_v60 }
  0x85   :  { %3824 = vmatpush1.bf16.msra.mxu1 %v5465_v9 }
  0x86   :  { %3826 = vmatprep.subr.bf16.mxu1 %v5469_v51 }
  0x89   :  { %3828 = vmatpush1.bf16.msra.mxu1 %v5480_v21 }
  0x8a   :  { %3830 = vmatprep.subr.bf16.mxu1 %v5484_v24 }
  0x8d   :  { %3832 = vmatpush1.bf16.msra.mxu1 %v5495_v30 }
  0x8e   :  { %3866 = vmatprep.subr.bf16.mxu1 %v5277_v20 }
  0xf3   :  { %v5561_v17 = vpop.f32.mrb[0].mxu1 }
  0xf4   :  { %v5563_v26 = vpop.f32.mrb[1].mxu1 }
  0xf7   :  { %v5565_v34 = vpop.f32.mrb[2].mxu1 }
  0xf8   :  { %v5567_v42 = vpop.f32.mrb[3].mxu1 }
  0xfb   :  { %v5569_v14 = vpop.f32.mrb[4].mxu1 }
  0xfc   :  { %v5571_v31 = vpop.f32.mrb[5].mxu1 }
  0xff   :  { %v5573_v32 = vpop.f32.mrb[6].mxu1 }
 0x100   :  { %v5575_v37 = vpop.f32.mrb[7].mxu1 }
 0x123   :  { %v676_v33 = vpop.f32.mrb[0].mxu0 }
 0x124   :  { %v678_v40 = vpop.f32.mrb[1].mxu0  ;;  %v4755_v57 = vadd.f32 %v676_v33, %v5584_v54 }
 0x125   :  { %v4756_v55 = vadd.f32 %v678_v40, %v5582_v50 }
 0x126   :  { %v3604_v62 = vmul.f32 -1.442695, %v4755_v57 }
 0x127   :  { %v3605_v61 = vmul.f32 -1.442695, %v4756_v55 }
 0x129   :  { %4892 = vpow2.f32 %v3605_v61 }
 0x12a   :  { %4894 = vpow2.f32 %v3604_v62 }
 0x133   :  { %v4893_v8 = vpop.eup %4892 }
 0x134   :  { %v4895_v10 = vpop.eup %4894  ;;  %v766_v13 = vadd.f32 1.0, %v4893_v8 }
 0x135   :  { %v765_v18 = vadd.f32 1.0, %v4895_v10 }
 0x136   :  { %4896 = vrcp.f32 %v766_v13 }
 0x137   :  { %4898 = vrcp.f32 %v765_v18 }
 0x140   :  { %v4897_v4 = vpop.eup %4896 }
 0x141   :  { %v4899_v44 = vpop.eup %4898  ;;  %v775_v57 = vmul.f32 0.0, %v4897_v4 }
 0x143   :  { %v747_v63 = vpop.f32.mrb[8].mxu1 }
 0x144   :  { %v4795_v25 = vadd.f32 %v747_v63, %v5590_v11  ;;  %v749_v29 = vpop.f32.mrb[9].mxu1 }
 0x145   :  { %v4796_v33 = vadd.f32 %v749_v29, %v5592_v12 }
 0x146   :  { %v3606_v40 = vmul.f32 -1.442695, %v4795_v25 }
 0x147   :  { %4900 = vtanh.f32 %v4796_v33 }
 0x148   :  { %4902 = vpow2.f32 %v3606_v40 }
 0x151   :  { %v4901_v49 = vpop.eup %4900 }
 0x152   :  { %v4903_v55 = vpop.eup %4902  ;;  %v776_v47 = vmul.f32 %v4901_v49, %v4899_v44 }
 0x153   :  { %v767_v61 = vadd.f32 1.0, %v4903_v55 }
 0x154   :  { %v5596_v62 = vadd.f32 %v776_v47, %v775_v57 }
 0x155   :  { %4904 = vrcp.f32 %v767_v61 }
 0x156   :  { %4906 = vtanh.f32 %v5596_v62 }
 0x15f   :  { %v4905_v2 = vpop.eup %4904 }
 0x160   :  { %v4907_v5 = vpop.eup %4906 }
 0x161   :  { %v779_v8 = vmul.f32 %v4907_v5, %v4905_v2 }
 0x163   :  { %852 = vmatmul.mubr.f32.vlgmr.msra.gmra.mrb[2].mxu0 %v779_v8  ;;  %923 = vmatmul.mubr.f32.vlgmr.msra.gmra.mrb[10].mxu1 %v779_v8 }
 0x164   :  { %3836 = vmatpush1.bf16.msra.mxu0 %v5297_v27  ;;  %3868 = vmatpush1.bf16.msra.mxu1 %v5358_v52 }
 0x165   :  { %3838 = vmatprep.subr.bf16.mxu0 %v5301_v28  ;;  %3870 = vmatprep.subr.bf16.mxu1 %v5360_v53 }
 0x166   :  { %1028 = vmatprep.mubr.f32.mxu0 %v5202_v3  ;;  %1099 = vmatprep.mubr.f32.mxu1 %v5202_v3 }
 0x168   :  { %3840 = vmatpush1.bf16.msra.mxu0 %v5320_v35  ;;  %3872 = vmatpush1.bf16.msra.mxu1 %v5379_v0 }
 0x169   :  { %3842 = vmatprep.subr.bf16.mxu0 %v5323_v36  ;;  %3874 = vmatprep.subr.bf16.mxu1 %v5384_v6 }
 0x16c   :  { %3844 = vmatpush1.bf16.msra.mxu0 %v5342_v45  ;;  %3876 = vmatpush1.bf16.msra.mxu1 %v5401_v15 }
 0x16d   :  { %3846 = vmatprep.subr.bf16.mxu0 %v5345_v48  ;;  %3878 = vmatprep.subr.bf16.mxu1 %v5409_v23 }
 0x170   :  { %3848 = vmatpush1.bf16.msra.mxu0 %v5364_v56  ;;  %3880 = vmatpush1.bf16.msra.mxu1 %v5426_v39 }
 0x171   :  { %3850 = vmatprep.subr.bf16.mxu0 %v5381_v1  ;;  %3882 = vmatprep.subr.bf16.mxu1 %v5432_v46 }
 0x174   :  { %3852 = vmatpush1.bf16.msra.mxu0 %v5386_v7  ;;  %3884 = vmatpush1.bf16.msra.mxu1 %v5447_v59 }
 0x175   :  { %3854 = vmatprep.subr.bf16.mxu0 %v5403_v16  ;;  %3886 = vmatprep.subr.bf16.mxu1 %v5453_v60 }
 0x178   :  { %3856 = vmatpush1.bf16.msra.mxu0 %v5407_v22  ;;  %3888 = vmatpush1.bf16.msra.mxu1 %v5465_v9 }
 0x179   :  { %3858 = vmatprep.subr.bf16.mxu0 %v5424_v38  ;;  %3890 = vmatprep.subr.bf16.mxu1 %v5469_v51 }
 0x17c   :  { %3860 = vmatpush1.bf16.msra.mxu0 %v5430_v43  ;;  %3892 = vmatpush1.bf16.msra.mxu1 %v5480_v21 }
 0x17d   :  { %3862 = vmatprep.subr.bf16.mxu0 %v5445_v58  ;;  %3894 = vmatprep.subr.bf16.mxu1 %v5484_v24 }
 0x180   :  { %3864 = vmatpush1.bf16.msra.mxu0 %v5450_v41  ;;  %3896 = vmatpush1.bf16.msra.mxu1 %v5495_v30 }
 0x181   :  { %3898 = vmatprep.subr.bf16.mxu0 %v5275_v19  ;;  %3930 = vmatprep.subr.bf16.mxu1 %v5277_v20 }
 0x236   :  { %v853_v10 = vpop.f32.mrb[2].mxu0  ;;  %v924_v13 = vpop.f32.mrb[10].mxu1 }
 0x237   :  { %v4757_v18 = vadd.f32 %v853_v10, %v5584_v54  ;;  %v855_v63 = vpop.f32.mrb[3].mxu0  ;;  %v926_v25 = vpop.f32.mrb[11].mxu1  ;;  %v4797_v4 = vadd.f32 %v924_v13, %v5590_v11 }
 0x238   :  { %v4758_v29 = vadd.f32 %v855_v63, %v5582_v50  ;;  %v4798_v44 = vadd.f32 %v926_v25, %v5592_v12 }
 0x239   :  { %v3607_v33 = vmul.f32 -1.442695, %v4757_v18  ;;  %v3609_v49 = vmul.f32 -1.442695, %v4797_v4 }
 0x23a   :  { %v3608_v40 = vmul.f32 -1.442695, %v4758_v29 }
 0x23b   :  { %4908 = vpow2.f32 %v3607_v33 }
 0x23c   :  { %4910 = vpow2.f32 %v3608_v40 }
 0x23d   :  { %4912 = vtanh.f32 %v4798_v44 }
 0x23e   :  { %4914 = vpow2.f32 %v3609_v49 }
 0x245   :  { %v4909_v55 = vpop.eup %4908 }
 0x246   :  { %v942_v57 = vadd.f32 1.0, %v4909_v55  ;;  %v4911_v47 = vpop.eup %4910 }
 0x247   :  { %v943_v61 = vadd.f32 1.0, %v4911_v47  ;;  %v4913_v2 = vpop.eup %4912 }
 0x248   :  { %4916 = vrcp.f32 %v942_v57  ;;  %v4915_v5 = vpop.eup %4914 }
 0x249   :  { %4918 = vrcp.f32 %v943_v61  ;;  %v944_v63 = vadd.f32 1.0, %v4915_v5 }
 0x24b   :  { %4920 = vrcp.f32 %v944_v63 }
 0x252   :  { %v4917_v8 = vpop.eup %4916 }
 0x253   :  { %v953_v10 = vmul.f32 %v4917_v8, %v4913_v2  ;;  %v4919_v18 = vpop.eup %4918 }
 0x254   :  { %v952_v29 = vmul.f32 %v4919_v18, %v5596_v62 }
 0x255   :  { %v4921_v25 = vpop.eup %4920 }
 0x256   :  { %v5638_v13 = vadd.f32 %v953_v10, %v952_v29 }
 0x258   :  { %4922 = vtanh.f32 %v5638_v13 }
 0x262   :  { %v4923_v33 = vpop.eup %4922 }
 0x263   :  { %v956_v40 = vmul.f32 %v4923_v33, %v4921_v25 }
 0x265   :  { %1029 = vmatmul.mubr.f32.vlgmr.msra.gmra.mrb[4].mxu0 %v956_v40  ;;  %1100 = vmatmul.mubr.f32.vlgmr.msra.gmra.mrb[12].mxu1 %v956_v40 }
 0x266   :  { %3900 = vmatpush1.bf16.msra.mxu0 %v5297_v27  ;;  %3932 = vmatpush1.bf16.msra.mxu1 %v5358_v52 }
 0x267   :  { %3902 = vmatprep.subr.bf16.mxu0 %v5301_v28  ;;  %3934 = vmatprep.subr.bf16.mxu1 %v5360_v53 }
 0x268   :  { %1205 = vmatprep.mubr.f32.mxu0 %v5202_v3  ;;  %1276 = vmatprep.mubr.f32.mxu1 %v5202_v3 }
 0x26a   :  { %3904 = vmatpush1.bf16.msra.mxu0 %v5320_v35  ;;  %3936 = vmatpush1.bf16.msra.mxu1 %v5379_v0 }
 0x26b   :  { %3906 = vmatprep.subr.bf16.mxu0 %v5323_v36  ;;  %3938 = vmatprep.subr.bf16.mxu1 %v5384_v6 }
 0x26e   :  { %3908 = vmatpush1.bf16.msra.mxu0 %v5342_v45  ;;  %3940 = vmatpush1.bf16.msra.mxu1 %v5401_v15 }
 0x26f   :  { %3910 = vmatprep.subr.bf16.mxu0 %v5345_v48  ;;  %3942 = vmatprep.subr.bf16.mxu1 %v5409_v23 }
 0x272   :  { %3912 = vmatpush1.bf16.msra.mxu0 %v5364_v56  ;;  %3944 = vmatpush1.bf16.msra.mxu1 %v5426_v39 }
 0x273   :  { %3914 = vmatprep.subr.bf16.mxu0 %v5381_v1  ;;  %3946 = vmatprep.subr.bf16.mxu1 %v5432_v46 }
 0x276   :  { %3916 = vmatpush1.bf16.msra.mxu0 %v5386_v7  ;;  %3948 = vmatpush1.bf16.msra.mxu1 %v5447_v59 }
 0x277   :  { %3918 = vmatprep.subr.bf16.mxu0 %v5403_v16  ;;  %3950 = vmatprep.subr.bf16.mxu1 %v5453_v60 }
 0x27a   :  { %3920 = vmatpush1.bf16.msra.mxu0 %v5407_v22  ;;  %3952 = vmatpush1.bf16.msra.mxu1 %v5465_v9 }
 0x27b   :  { %3922 = vmatprep.subr.bf16.mxu0 %v5424_v38  ;;  %3954 = vmatprep.subr.bf16.mxu1 %v5469_v51 }
 0x27e   :  { %3924 = vmatpush1.bf16.msra.mxu0 %v5430_v43  ;;  %3956 = vmatpush1.bf16.msra.mxu1 %v5480_v21 }
 0x27f   :  { %3926 = vmatprep.subr.bf16.mxu0 %v5445_v58  ;;  %3958 = vmatprep.subr.bf16.mxu1 %v5484_v24 }
 0x282   :  { %3928 = vmatpush1.bf16.msra.mxu0 %v5450_v41  ;;  %3960 = vmatpush1.bf16.msra.mxu1 %v5495_v30 }
 0x283   :  { %3962 = vmatprep.subr.bf16.mxu0 %v5275_v19  ;;  %3994 = vmatprep.subr.bf16.mxu1 %v5277_v20 }
 0x338   :  { %v1030_v62 = vpop.f32.mrb[4].mxu0  ;;  %v1101_v4 = vpop.f32.mrb[12].mxu1 }
 0x339   :  { %v4759_v44 = vadd.f32 %v1030_v62, %v5584_v54  ;;  %v1032_v49 = vpop.f32.mrb[5].mxu0  ;;  %v1103_v55 = vpop.f32.mrb[13].mxu1  ;;  %v4799_v2 = vadd.f32 %v1101_v4, %v5590_v11 }
 0x33a   :  { %v4760_v57 = vadd.f32 %v1032_v49, %v5582_v50  ;;  %v4800_v5 = vadd.f32 %v1103_v55, %v5592_v12 }
 0x33b   :  { %v3610_v47 = vmul.f32 -1.442695, %v4759_v44  ;;  %v3612_v8 = vmul.f32 -1.442695, %v4799_v2 }
 0x33c   :  { %v3611_v61 = vmul.f32 -1.442695, %v4760_v57 }
 0x33d   :  { %4924 = vpow2.f32 %v3610_v47 }
 0x33e   :  { %4926 = vpow2.f32 %v3611_v61 }
 0x33f   :  { %4928 = vtanh.f32 %v4800_v5 }
 0x340   :  { %4930 = vpow2.f32 %v3612_v8 }
 0x347   :  { %v4925_v10 = vpop.eup %4924 }
 0x348   :  { %v1119_v18 = vadd.f32 1.0, %v4925_v10  ;;  %v4927_v63 = vpop.eup %4926 }
 0x349   :  { %v1120_v29 = vadd.f32 1.0, %v4927_v63  ;;  %v4929_v25 = vpop.eup %4928 }
 0x34a   :  { %4932 = vrcp.f32 %v1119_v18  ;;  %v4931_v33 = vpop.eup %4930 }
 0x34b   :  { %4934 = vrcp.f32 %v1120_v29  ;;  %v1121_v49 = vadd.f32 1.0, %v4931_v33 }
 0x34d   :  { %4936 = vrcp.f32 %v1121_v49 }
 0x354   :  { %v4933_v40 = vpop.eup %4932 }
 0x355   :  { %v1130_v62 = vmul.f32 %v4933_v40, %v4929_v25  ;;  %v4935_v44 = vpop.eup %4934 }
 0x356   :  { %v1129_v57 = vmul.f32 %v4935_v44, %v5638_v13 }
 0x357   :  { %v4937_v55 = vpop.eup %4936 }
 0x358   :  { %v5680_v4 = vadd.f32 %v1130_v62, %v1129_v57 }
 0x35a   :  { %4938 = vtanh.f32 %v5680_v4 }
 0x364   :  { %v4939_v47 = vpop.eup %4938 }
 0x365   :  { %v1133_v61 = vmul.f32 %v4939_v47, %v4937_v55 }
 0x367   :  { %1206 = vmatmul.mubr.f32.vlgmr.msra.gmra.mrb[6].mxu0 %v1133_v61  ;;  %1277 = vmatmul.mubr.f32.vlgmr.msra.gmra.mrb[14].mxu1 %v1133_v61 }
 0x368   :  { %3964 = vmatpush1.bf16.msra.mxu0 %v5297_v27  ;;  %3996 = vmatpush1.bf16.msra.mxu1 %v5358_v52 }
 0x369   :  { %3966 = vmatprep.subr.bf16.mxu0 %v5301_v28  ;;  %3998 = vmatprep.subr.bf16.mxu1 %v5360_v53 }
 0x36a   :  { %1382 = vmatprep.mubr.f32.mxu0 %v5202_v3  ;;  %1453 = vmatprep.mubr.f32.mxu1 %v5202_v3 }
 0x36c   :  { %3968 = vmatpush1.bf16.msra.mxu0 %v5320_v35  ;;  %4000 = vmatpush1.bf16.msra.mxu1 %v5379_v0 }
 0x36d   :  { %3970 = vmatprep.subr.bf16.mxu0 %v5323_v36  ;;  %4002 = vmatprep.subr.bf16.mxu1 %v5384_v6 }
 0x370   :  { %3972 = vmatpush1.bf16.msra.mxu0 %v5342_v45  ;;  %4004 = vmatpush1.bf16.msra.mxu1 %v5401_v15 }
 0x371   :  { %3974 = vmatprep.subr.bf16.mxu0 %v5345_v48  ;;  %4006 = vmatprep.subr.bf16.mxu1 %v5409_v23 }
 0x374   :  { %3976 = vmatpush1.bf16.msra.mxu0 %v5364_v56  ;;  %4008 = vmatpush1.bf16.msra.mxu1 %v5426_v39 }
 0x375   :  { %3978 = vmatprep.subr.bf16.mxu0 %v5381_v1  ;;  %4010 = vmatprep.subr.bf16.mxu1 %v5432_v46 }
 0x378   :  { %3980 = vmatpush1.bf16.msra.mxu0 %v5386_v7  ;;  %4012 = vmatpush1.bf16.msra.mxu1 %v5447_v59 }
 0x379   :  { %3982 = vmatprep.subr.bf16.mxu0 %v5403_v16  ;;  %4014 = vmatprep.subr.bf16.mxu1 %v5453_v60 }
 0x37c   :  { %3984 = vmatpush1.bf16.msra.mxu0 %v5407_v22  ;;  %4016 = vmatpush1.bf16.msra.mxu1 %v5465_v9 }
 0x37d   :  { %3986 = vmatprep.subr.bf16.mxu0 %v5424_v38  ;;  %4018 = vmatprep.subr.bf16.mxu1 %v5469_v51 }
 0x380   :  { %3988 = vmatpush1.bf16.msra.mxu0 %v5430_v43  ;;  %4020 = vmatpush1.bf16.msra.mxu1 %v5480_v21 }
 0x381   :  { %3990 = vmatprep.subr.bf16.mxu0 %v5445_v58  ;;  %4022 = vmatprep.subr.bf16.mxu1 %v5484_v24 }
 0x384   :  { %3992 = vmatpush1.bf16.msra.mxu0 %v5450_v41  ;;  %4024 = vmatpush1.bf16.msra.mxu1 %v5495_v30 }
 0x385   :  { %4026 = vmatprep.subr.bf16.mxu0 %v5275_v19  ;;  %4058 = vmatprep.subr.bf16.mxu1 %v5277_v20 }
 0x43a   :  { %v1207_v13 = vpop.f32.mrb[6].mxu0  ;;  %v1278_v2 = vpop.f32.mrb[14].mxu1 }
 0x43b   :  { %v4761_v5 = vadd.f32 %v1207_v13, %v5584_v54  ;;  %v1209_v8 = vpop.f32.mrb[7].mxu0  ;;  %v1280_v10 = vpop.f32.mrb[15].mxu1  ;;  %v4801_v25 = vadd.f32 %v1278_v2, %v5590_v11 }
 0x43c   :  { %v4762_v18 = vadd.f32 %v1209_v8, %v5582_v50  ;;  %v4802_v33 = vadd.f32 %v1280_v10, %v5592_v12 }
 0x43d   :  { %v3613_v63 = vmul.f32 -1.442695, %v4761_v5  ;;  %v3615_v40 = vmul.f32 -1.442695, %v4801_v25 }
 0x43e   :  { %v3614_v29 = vmul.f32 -1.442695, %v4762_v18 }
 0x43f   :  { %4940 = vpow2.f32 %v3613_v63 }
 0x440   :  { %4942 = vpow2.f32 %v3614_v29 }
 0x441   :  { %4944 = vtanh.f32 %v4802_v33 }
 0x442   :  { %4946 = vpow2.f32 %v3615_v40 }
 0x449   :  { %v4941_v62 = vpop.eup %4940 }
 0x44a   :  { %v1296_v44 = vadd.f32 1.0, %v4941_v62  ;;  %v4943_v49 = vpop.eup %4942 }
 0x44b   :  { %v1297_v57 = vadd.f32 1.0, %v4943_v49  ;;  %v4945_v55 = vpop.eup %4944 }
 0x44c   :  { %4948 = vrcp.f32 %v1296_v44  ;;  %v4947_v47 = vpop.eup %4946 }
 0x44d   :  { %4950 = vrcp.f32 %v1297_v57  ;;  %v1298_v8 = vadd.f32 1.0, %v4947_v47 }
 0x44f   :  { %4952 = vrcp.f32 %v1298_v8 }
 0x456   :  { %v4949_v61 = vpop.eup %4948 }
 0x457   :  { %v1307_v13 = vmul.f32 %v4949_v61, %v4945_v55  ;;  %v4951_v5 = vpop.eup %4950 }
 0x458   :  { %v1306_v18 = vmul.f32 %v4951_v5, %v5680_v4 }
 0x459   :  { %v4953_v10 = vpop.eup %4952 }
 0x45a   :  { %v5722_v2 = vadd.f32 %v1307_v13, %v1306_v18 }
 0x45c   :  { %4954 = vtanh.f32 %v5722_v2 }
 0x466   :  { %v4955_v63 = vpop.eup %4954 }
 0x467   :  { %v1310_v29 = vmul.f32 %v4955_v63, %v4953_v10 }
 0x469   :  { %1383 = vmatmul.mubr.f32.vlgmr.msra.gmra.mrb[8].mxu0 %v1310_v29  ;;  %1454 = vmatmul.mubr.f32.vlgmr.msra.gmra.mrb[16].mxu1 %v1310_v29 }
 0x46a   :  { %4028 = vmatpush1.bf16.msra.mxu0 %v5297_v27  ;;  %4060 = vmatpush1.bf16.msra.mxu1 %v5358_v52 }
 0x46b   :  { %4030 = vmatprep.subr.bf16.mxu0 %v5301_v28  ;;  %4062 = vmatprep.subr.bf16.mxu1 %v5360_v53 }
 0x46c   :  { %1559 = vmatprep.mubr.f32.mxu0 %v5202_v3  ;;  %1630 = vmatprep.mubr.f32.mxu1 %v5202_v3 }
 0x46e   :  { %4032 = vmatpush1.bf16.msra.mxu0 %v5320_v35  ;;  %4064 = vmatpush1.bf16.msra.mxu1 %v5379_v0 }
 0x46f   :  { %4034 = vmatprep.subr.bf16.mxu0 %v5323_v36  ;;  %4066 = vmatprep.subr.bf16.mxu1 %v5384_v6 }
 0x472   :  { %4036 = vmatpush1.bf16.msra.mxu0 %v5342_v45  ;;  %4068 = vmatpush1.bf16.msra.mxu1 %v5401_v15 }
 0x473   :  { %4038 = vmatprep.subr.bf16.mxu0 %v5345_v48  ;;  %4070 = vmatprep.subr.bf16.mxu1 %v5409_v23 }
 0x476   :  { %4040 = vmatpush1.bf16.msra.mxu0 %v5364_v56  ;;  %4072 = vmatpush1.bf16.msra.mxu1 %v5426_v39 }
 0x477   :  { %4042 = vmatprep.subr.bf16.mxu0 %v5381_v1  ;;  %4074 = vmatprep.subr.bf16.mxu1 %v5432_v46 }
 0x47a   :  { %4044 = vmatpush1.bf16.msra.mxu0 %v5386_v7  ;;  %4076 = vmatpush1.bf16.msra.mxu1 %v5447_v59 }
 0x47b   :  { %4046 = vmatprep.subr.bf16.mxu0 %v5403_v16  ;;  %4078 = vmatprep.subr.bf16.mxu1 %v5453_v60 }
 0x47e   :  { %4048 = vmatpush1.bf16.msra.mxu0 %v5407_v22  ;;  %4080 = vmatpush1.bf16.msra.mxu1 %v5465_v9 }
 0x47f   :  { %4050 = vmatprep.subr.bf16.mxu0 %v5424_v38  ;;  %4082 = vmatprep.subr.bf16.mxu1 %v5469_v51 }
 0x482   :  { %4052 = vmatpush1.bf16.msra.mxu0 %v5430_v43  ;;  %4084 = vmatpush1.bf16.msra.mxu1 %v5480_v21 }
 0x483   :  { %4054 = vmatprep.subr.bf16.mxu0 %v5445_v58  ;;  %4086 = vmatprep.subr.bf16.mxu1 %v5484_v24 }
 0x486   :  { %4056 = vmatpush1.bf16.msra.mxu0 %v5450_v41  ;;  %4088 = vmatpush1.bf16.msra.mxu1 %v5495_v30 }
 0x487   :  { %4090 = vmatprep.subr.bf16.mxu0 %v5275_v19  ;;  %4122 = vmatprep.subr.bf16.mxu1 %v5277_v20 }
 0x53c   :  { %v1384_v4 = vpop.f32.mrb[8].mxu0  ;;  %v1455_v25 = vpop.f32.mrb[16].mxu1 }
 0x53d   :  { %v4763_v33 = vadd.f32 %v1384_v4, %v5584_v54  ;;  %v1386_v40 = vpop.f32.mrb[9].mxu0  ;;  %v1457_v62 = vpop.f32.mrb[17].mxu1  ;;  %v4803_v55 = vadd.f32 %v1455_v25, %v5590_v11 }
 0x53e   :  { %v4764_v44 = vadd.f32 %v1386_v40, %v5582_v50  ;;  %v4804_v47 = vadd.f32 %v1457_v62, %v5592_v12 }
 0x53f   :  { %v3616_v49 = vmul.f32 -1.442695, %v4763_v33  ;;  %v3618_v61 = vmul.f32 -1.442695, %v4803_v55 }
 0x540   :  { %v3617_v57 = vmul.f32 -1.442695, %v4764_v44 }
 0x541   :  { %4956 = vpow2.f32 %v3616_v49 }
 0x542   :  { %4958 = vpow2.f32 %v3617_v57 }
 0x543   :  { %4960 = vtanh.f32 %v4804_v47 }
 0x544   :  { %4962 = vpow2.f32 %v3618_v61 }
 0x54b   :  { %v4957_v13 = vpop.eup %4956 }
 0x54c   :  { %v1473_v5 = vadd.f32 1.0, %v4957_v13  ;;  %v4959_v8 = vpop.eup %4958 }
 0x54d   :  { %v1474_v18 = vadd.f32 1.0, %v4959_v8  ;;  %v4961_v10 = vpop.eup %4960 }
 0x54e   :  { %4964 = vrcp.f32 %v1473_v5  ;;  %v4963_v63 = vpop.eup %4962 }
 0x54f   :  { %4966 = vrcp.f32 %v1474_v18  ;;  %v1475_v40 = vadd.f32 1.0, %v4963_v63 }
 0x551   :  { %4968 = vrcp.f32 %v1475_v40 }
 0x558   :  { %v4965_v29 = vpop.eup %4964 }
 0x559   :  { %v1484_v4 = vmul.f32 %v4965_v29, %v4961_v10  ;;  %v4967_v33 = vpop.eup %4966 }
 0x55a   :  { %v1483_v44 = vmul.f32 %v4967_v33, %v5722_v2 }
 0x55b   :  { %v4969_v62 = vpop.eup %4968 }
 0x55c   :  { %v5764_v25 = vadd.f32 %v1484_v4, %v1483_v44 }
 0x55e   :  { %4970 = vtanh.f32 %v5764_v25 }
 0x568   :  { %v4971_v49 = vpop.eup %4970 }
 0x569   :  { %v1487_v57 = vmul.f32 %v4971_v49, %v4969_v62 }
 0x56b   :  { %1560 = vmatmul.mubr.f32.vlgmr.msra.gmra.mrb[10].mxu0 %v1487_v57  ;;  %1631 = vmatmul.mubr.f32.vlgmr.msra.gmra.mrb[18].mxu1 %v1487_v57 }
 0x56c   :  { %4092 = vmatpush1.bf16.msra.mxu0 %v5297_v27  ;;  %4124 = vmatpush1.bf16.msra.mxu1 %v5358_v52 }
 0x56d   :  { %4094 = vmatprep.subr.bf16.mxu0 %v5301_v28  ;;  %4126 = vmatprep.subr.bf16.mxu1 %v5360_v53 }
 0x56e   :  { %1736 = vmatprep.mubr.f32.mxu0 %v5202_v3  ;;  %1807 = vmatprep.mubr.f32.mxu1 %v5202_v3 }
 0x570   :  { %4096 = vmatpush1.bf16.msra.mxu0 %v5320_v35  ;;  %4128 = vmatpush1.bf16.msra.mxu1 %v5379_v0 }
 0x571   :  { %4098 = vmatprep.subr.bf16.mxu0 %v5323_v36  ;;  %4130 = vmatprep.subr.bf16.mxu1 %v5384_v6 }
 0x574   :  { %4100 = vmatpush1.bf16.msra.mxu0 %v5342_v45  ;;  %4132 = vmatpush1.bf16.msra.mxu1 %v5401_v15 }
 0x575   :  { %4102 = vmatprep.subr.bf16.mxu0 %v5345_v48  ;;  %4134 = vmatprep.subr.bf16.mxu1 %v5409_v23 }
 0x578   :  { %4104 = vmatpush1.bf16.msra.mxu0 %v5364_v56  ;;  %4136 = vmatpush1.bf16.msra.mxu1 %v5426_v39 }
 0x579   :  { %4106 = vmatprep.subr.bf16.mxu0 %v5381_v1  ;;  %4138 = vmatprep.subr.bf16.mxu1 %v5432_v46 }
 0x57c   :  { %4108 = vmatpush1.bf16.msra.mxu0 %v5386_v7  ;;  %4140 = vmatpush1.bf16.msra.mxu1 %v5447_v59 }
 0x57d   :  { %4110 = vmatprep.subr.bf16.mxu0 %v5403_v16  ;;  %4142 = vmatprep.subr.bf16.mxu1 %v5453_v60 }
 0x580   :  { %4112 = vmatpush1.bf16.msra.mxu0 %v5407_v22  ;;  %4144 = vmatpush1.bf16.msra.mxu1 %v5465_v9 }
 0x581   :  { %4114 = vmatprep.subr.bf16.mxu0 %v5424_v38  ;;  %4146 = vmatprep.subr.bf16.mxu1 %v5469_v51 }
 0x584   :  { %4116 = vmatpush1.bf16.msra.mxu0 %v5430_v43  ;;  %4148 = vmatpush1.bf16.msra.mxu1 %v5480_v21 }
 0x585   :  { %4118 = vmatprep.subr.bf16.mxu0 %v5445_v58  ;;  %4150 = vmatprep.subr.bf16.mxu1 %v5484_v24 }
 0x588   :  { %4120 = vmatpush1.bf16.msra.mxu0 %v5450_v41  ;;  %4152 = vmatpush1.bf16.msra.mxu1 %v5495_v30 }
 0x589   :  { %4154 = vmatprep.subr.bf16.mxu0 %v5275_v19  ;;  %4186 = vmatprep.subr.bf16.mxu1 %v5277_v20 }
 0x63e   :  { %v1561_v2 = vpop.f32.mrb[10].mxu0  ;;  %v1632_v55 = vpop.f32.mrb[18].mxu1 }
 0x63f   :  { %v4765_v47 = vadd.f32 %v1561_v2, %v5584_v54  ;;  %v1563_v61 = vpop.f32.mrb[11].mxu0  ;;  %v1634_v13 = vpop.f32.mrb[19].mxu1  ;;  %v4805_v10 = vadd.f32 %v1632_v55, %v5590_v11 }
 0x640   :  { %v4766_v5 = vadd.f32 %v1563_v61, %v5582_v50  ;;  %v4806_v63 = vadd.f32 %v1634_v13, %v5592_v12 }
 0x641   :  { %v3619_v8 = vmul.f32 -1.442695, %v4765_v47  ;;  %v3621_v29 = vmul.f32 -1.442695, %v4805_v10 }
 0x642   :  { %v3620_v18 = vmul.f32 -1.442695, %v4766_v5 }
 0x643   :  { %4972 = vpow2.f32 %v3619_v8 }
 0x644   :  { %4974 = vpow2.f32 %v3620_v18 }
 0x645   :  { %4976 = vtanh.f32 %v4806_v63 }
 0x646   :  { %4978 = vpow2.f32 %v3621_v29 }
 0x64d   :  { %v4973_v4 = vpop.eup %4972 }
 0x64e   :  { %v1650_v33 = vadd.f32 1.0, %v4973_v4  ;;  %v4975_v40 = vpop.eup %4974 }
 0x64f   :  { %v1651_v44 = vadd.f32 1.0, %v4975_v40  ;;  %v4977_v62 = vpop.eup %4976 }
 0x650   :  { %4980 = vrcp.f32 %v1650_v33  ;;  %v4979_v49 = vpop.eup %4978 }
 0x651   :  { %4982 = vrcp.f32 %v1651_v44  ;;  %v1652_v61 = vadd.f32 1.0, %v4979_v49 }
 0x653   :  { %4984 = vrcp.f32 %v1652_v61 }
 0x65a   :  { %v4981_v57 = vpop.eup %4980 }
 0x65b   :  { %v1661_v2 = vmul.f32 %v4981_v57, %v4977_v62  ;;  %v4983_v47 = vpop.eup %4982 }
 0x65c   :  { %v1660_v5 = vmul.f32 %v4983_v47, %v5764_v25 }
 0x65d   :  { %v4985_v13 = vpop.eup %4984 }
 0x65e   :  { %v5806_v55 = vadd.f32 %v1661_v2, %v1660_v5 }
 0x660   :  { %4986 = vtanh.f32 %v5806_v55 }
 0x66a   :  { %v4987_v8 = vpop.eup %4986 }
 0x66b   :  { %v1664_v18 = vmul.f32 %v4987_v8, %v4985_v13 }
 0x66d   :  { %1737 = vmatmul.mubr.f32.vlgmr.msra.gmra.mrb[12].mxu0 %v1664_v18  ;;  %1808 = vmatmul.mubr.f32.vlgmr.msra.gmra.mrb[20].mxu1 %v1664_v18 }
 0x66e   :  { %4156 = vmatpush1.bf16.msra.mxu0 %v5297_v27  ;;  %4188 = vmatpush1.bf16.msra.mxu1 %v5358_v52 }
 0x66f   :  { %4158 = vmatprep.subr.bf16.mxu0 %v5301_v28  ;;  %4190 = vmatprep.subr.bf16.mxu1 %v5360_v53 }
 0x670   :  { %1913 = vmatprep.mubr.f32.mxu0 %v5202_v3  ;;  %1984 = vmatprep.mubr.f32.mxu1 %v5202_v3 }
 0x672   :  { %4160 = vmatpush1.bf16.msra.mxu0 %v5320_v35  ;;  %4192 = vmatpush1.bf16.msra.mxu1 %v5379_v0 }
 0x673   :  { %4162 = vmatprep.subr.bf16.mxu0 %v5323_v36  ;;  %4194 = vmatprep.subr.bf16.mxu1 %v5384_v6 }
 0x676   :  { %4164 = vmatpush1.bf16.msra.mxu0 %v5342_v45  ;;  %4196 = vmatpush1.bf16.msra.mxu1 %v5401_v15 }
 0x677   :  { %4166 = vmatprep.subr.bf16.mxu0 %v5345_v48  ;;  %4198 = vmatprep.subr.bf16.mxu1 %v5409_v23 }
 0x67a   :  { %4168 = vmatpush1.bf16.msra.mxu0 %v5364_v56  ;;  %4200 = vmatpush1.bf16.msra.mxu1 %v5426_v39 }
 0x67b   :  { %4170 = vmatprep.subr.bf16.mxu0 %v5381_v1  ;;  %4202 = vmatprep.subr.bf16.mxu1 %v5432_v46 }
 0x67e   :  { %4172 = vmatpush1.bf16.msra.mxu0 %v5386_v7  ;;  %4204 = vmatpush1.bf16.msra.mxu1 %v5447_v59 }
 0x67f   :  { %4174 = vmatprep.subr.bf16.mxu0 %v5403_v16  ;;  %4206 = vmatprep.subr.bf16.mxu1 %v5453_v60 }
 0x682   :  { %4176 = vmatpush1.bf16.msra.mxu0 %v5407_v22  ;;  %4208 = vmatpush1.bf16.msra.mxu1 %v5465_v9 }
 0x683   :  { %4178 = vmatprep.subr.bf16.mxu0 %v5424_v38  ;;  %4210 = vmatprep.subr.bf16.mxu1 %v5469_v51 }
 0x686   :  { %4180 = vmatpush1.bf16.msra.mxu0 %v5430_v43  ;;  %4212 = vmatpush1.bf16.msra.mxu1 %v5480_v21 }
 0x687   :  { %4182 = vmatprep.subr.bf16.mxu0 %v5445_v58  ;;  %4214 = vmatprep.subr.bf16.mxu1 %v5484_v24 }
 0x68a   :  { %4184 = vmatpush1.bf16.msra.mxu0 %v5450_v41  ;;  %4216 = vmatpush1.bf16.msra.mxu1 %v5495_v30 }
 0x68b   :  { %4218 = vmatprep.subr.bf16.mxu0 %v5275_v19  ;;  %4250 = vmatprep.subr.bf16.mxu1 %v5277_v20 }
 0x740   :  { %v1738_v25 = vpop.f32.mrb[12].mxu0  ;;  %v1809_v10 = vpop.f32.mrb[20].mxu1 }
 0x741   :  { %v4767_v63 = vadd.f32 %v1738_v25, %v5584_v54  ;;  %v1740_v29 = vpop.f32.mrb[13].mxu0  ;;  %v1811_v4 = vpop.f32.mrb[21].mxu1  ;;  %v4807_v62 = vadd.f32 %v1809_v10, %v5590_v11 }
 0x742   :  { %v4768_v33 = vadd.f32 %v1740_v29, %v5582_v50  ;;  %v4808_v49 = vadd.f32 %v1811_v4, %v5592_v12 }
 0x743   :  { %v3622_v40 = vmul.f32 -1.442695, %v4767_v63  ;;  %v3624_v57 = vmul.f32 -1.442695, %v4807_v62 }
 0x744   :  { %v3623_v44 = vmul.f32 -1.442695, %v4768_v33 }
 0x745   :  { %4988 = vpow2.f32 %v3622_v40 }
 0x746   :  { %4990 = vpow2.f32 %v3623_v44 }
 0x747   :  { %4992 = vtanh.f32 %v4808_v49 }
 0x748   :  { %4994 = vpow2.f32 %v3624_v57 }
 0x74f   :  { %v4989_v2 = vpop.eup %4988 }
 0x750   :  { %v1827_v47 = vadd.f32 1.0, %v4989_v2  ;;  %v4991_v61 = vpop.eup %4990 }
 0x751   :  { %v1828_v5 = vadd.f32 1.0, %v4991_v61  ;;  %v4993_v13 = vpop.eup %4992 }
 0x752   :  { %4996 = vrcp.f32 %v1827_v47  ;;  %v4995_v8 = vpop.eup %4994 }
 0x753   :  { %4998 = vrcp.f32 %v1828_v5  ;;  %v1829_v29 = vadd.f32 1.0, %v4995_v8 }
 0x755   :  { %5000 = vrcp.f32 %v1829_v29 }
 0x75c   :  { %v4997_v18 = vpop.eup %4996 }
 0x75d   :  { %v1838_v25 = vmul.f32 %v4997_v18, %v4993_v13  ;;  %v4999_v63 = vpop.eup %4998 }
 0x75e   :  { %v1837_v33 = vmul.f32 %v4999_v63, %v5806_v55 }
 0x75f   :  { %v5001_v4 = vpop.eup %5000 }
 0x760   :  { %v5848_v10 = vadd.f32 %v1838_v25, %v1837_v33 }
 0x762   :  { %5002 = vtanh.f32 %v5848_v10 }
 0x76c   :  { %v5003_v40 = vpop.eup %5002 }
 0x76d   :  { %v1841_v44 = vmul.f32 %v5003_v40, %v5001_v4 }
 0x76f   :  { %1914 = vmatmul.mubr.f32.vlgmr.msra.gmra.mrb[14].mxu0 %v1841_v44  ;;  %1985 = vmatmul.mubr.f32.vlgmr.msra.gmra.mrb[22].mxu1 %v1841_v44 }
 0x770   :  { %4220 = vmatpush1.bf16.msra.mxu0 %v5297_v27  ;;  %4252 = vmatpush1.bf16.msra.mxu1 %v5358_v52 }
 0x771   :  { %4222 = vmatprep.subr.bf16.mxu0 %v5301_v28  ;;  %4254 = vmatprep.subr.bf16.mxu1 %v5360_v53 }
 0x772   :  { %2090 = vmatprep.mubr.f32.mxu0 %v5202_v3  ;;  %2161 = vmatprep.mubr.f32.mxu1 %v5202_v3 }
 0x774   :  { %4224 = vmatpush1.bf16.msra.mxu0 %v5320_v35  ;;  %4256 = vmatpush1.bf16.msra.mxu1 %v5379_v0 }
 0x775   :  { %4226 = vmatprep.subr.bf16.mxu0 %v5323_v36  ;;  %4258 = vmatprep.subr.bf16.mxu1 %v5384_v6 }
 0x778   :  { %4228 = vmatpush1.bf16.msra.mxu0 %v5342_v45  ;;  %4260 = vmatpush1.bf16.msra.mxu1 %v5401_v15 }
 0x779   :  { %4230 = vmatprep.subr.bf16.mxu0 %v5345_v48  ;;  %4262 = vmatprep.subr.bf16.mxu1 %v5409_v23 }
 0x77c   :  { %4232 = vmatpush1.bf16.msra.mxu0 %v5364_v56  ;;  %4264 = vmatpush1.bf16.msra.mxu1 %v5426_v39 }
 0x77d   :  { %4234 = vmatprep.subr.bf16.mxu0 %v5381_v1  ;;  %4266 = vmatprep.subr.bf16.mxu1 %v5432_v46 }
 0x780   :  { %4236 = vmatpush1.bf16.msra.mxu0 %v5386_v7  ;;  %4268 = vmatpush1.bf16.msra.mxu1 %v5447_v59 }
 0x781   :  { %4238 = vmatprep.subr.bf16.mxu0 %v5403_v16  ;;  %4270 = vmatprep.subr.bf16.mxu1 %v5453_v60 }
 0x784   :  { %4240 = vmatpush1.bf16.msra.mxu0 %v5407_v22  ;;  %4272 = vmatpush1.bf16.msra.mxu1 %v5465_v9 }
 0x785   :  { %4242 = vmatprep.subr.bf16.mxu0 %v5424_v38  ;;  %4274 = vmatprep.subr.bf16.mxu1 %v5469_v51 }
 0x788   :  { %4244 = vmatpush1.bf16.msra.mxu0 %v5430_v43  ;;  %4276 = vmatpush1.bf16.msra.mxu1 %v5480_v21 }
 0x789   :  { %4246 = vmatprep.subr.bf16.mxu0 %v5445_v58  ;;  %4278 = vmatprep.subr.bf16.mxu1 %v5484_v24 }
 0x78c   :  { %4248 = vmatpush1.bf16.msra.mxu0 %v5450_v41  ;;  %4280 = vmatpush1.bf16.msra.mxu1 %v5495_v30 }
 0x78d   :  { %4282 = vmatprep.subr.bf16.mxu0 %v5275_v19  ;;  %4314 = vmatprep.subr.bf16.mxu1 %v5277_v20 }
 0x842   :  { %v1915_v55 = vpop.f32.mrb[14].mxu0  ;;  %v1986_v62 = vpop.f32.mrb[22].mxu1 }
 0x843   :  { %v4769_v49 = vadd.f32 %v1915_v55, %v5584_v54  ;;  %v1917_v57 = vpop.f32.mrb[15].mxu0  ;;  %v1988_v2 = vpop.f32.mrb[23].mxu1  ;;  %v4809_v13 = vadd.f32 %v1986_v62, %v5590_v11 }
 0x844   :  { %v4770_v47 = vadd.f32 %v1917_v57, %v5582_v50  ;;  %v4810_v8 = vadd.f32 %v1988_v2, %v5592_v12 }
 0x845   :  { %v3625_v61 = vmul.f32 -1.442695, %v4769_v49  ;;  %v3627_v18 = vmul.f32 -1.442695, %v4809_v13 }
 0x846   :  { %v3626_v5 = vmul.f32 -1.442695, %v4770_v47 }
 0x847   :  { %5004 = vpow2.f32 %v3625_v61 }
 0x848   :  { %5006 = vpow2.f32 %v3626_v5 }
 0x849   :  { %5008 = vtanh.f32 %v4810_v8 }
 0x84a   :  { %5010 = vpow2.f32 %v3627_v18 }
 0x851   :  { %v5005_v25 = vpop.eup %5004 }
 0x852   :  { %v2004_v63 = vadd.f32 1.0, %v5005_v25  ;;  %v5007_v29 = vpop.eup %5006 }
 0x853   :  { %v2005_v33 = vadd.f32 1.0, %v5007_v29  ;;  %v5009_v4 = vpop.eup %5008 }
 0x854   :  { %5012 = vrcp.f32 %v2004_v63  ;;  %v5011_v40 = vpop.eup %5010 }
 0x855   :  { %5014 = vrcp.f32 %v2005_v33  ;;  %v2006_v57 = vadd.f32 1.0, %v5011_v40 }
 0x857   :  { %5016 = vrcp.f32 %v2006_v57 }
 0x85e   :  { %v5013_v44 = vpop.eup %5012 }
 0x85f   :  { %v2015_v55 = vmul.f32 %v5013_v44, %v5009_v4  ;;  %v5015_v49 = vpop.eup %5014 }
 0x860   :  { %v2014_v47 = vmul.f32 %v5015_v49, %v5848_v10 }
 0x861   :  { %v5017_v2 = vpop.eup %5016 }
 0x862   :  { %v5890_v62 = vadd.f32 %v2015_v55, %v2014_v47 }
 0x864   :  { %5018 = vtanh.f32 %v5890_v62 }
 0x86e   :  { %v5019_v61 = vpop.eup %5018 }
 0x86f   :  { %v2018_v5 = vmul.f32 %v5019_v61, %v5017_v2 }
 0x871   :  { %2091 = vmatmul.mubr.f32.vlgmr.msra.gmra.mrb[16].mxu0 %v2018_v5  ;;  %2162 = vmatmul.mubr.f32.vlgmr.msra.gmra.mrb[24].mxu1 %v2018_v5 }
 0x872   :  { %4284 = vmatpush1.bf16.msra.mxu0 %v5297_v27  ;;  %4316 = vmatpush1.bf16.msra.mxu1 %v5358_v52 }
 0x873   :  { %4286 = vmatprep.subr.bf16.mxu0 %v5301_v28  ;;  %4318 = vmatprep.subr.bf16.mxu1 %v5360_v53 }
 0x874   :  { %2267 = vmatprep.mubr.f32.mxu0 %v5202_v3  ;;  %2338 = vmatprep.mubr.f32.mxu1 %v5202_v3 }
 0x876   :  { %4288 = vmatpush1.bf16.msra.mxu0 %v5320_v35  ;;  %4320 = vmatpush1.bf16.msra.mxu1 %v5379_v0 }
 0x877   :  { %4290 = vmatprep.subr.bf16.mxu0 %v5323_v36  ;;  %4322 = vmatprep.subr.bf16.mxu1 %v5384_v6 }
 0x87a   :  { %4292 = vmatpush1.bf16.msra.mxu0 %v5342_v45  ;;  %4324 = vmatpush1.bf16.msra.mxu1 %v5401_v15 }
 0x87b   :  { %4294 = vmatprep.subr.bf16.mxu0 %v5345_v48  ;;  %4326 = vmatprep.subr.bf16.mxu1 %v5409_v23 }
 0x87e   :  { %4296 = vmatpush1.bf16.msra.mxu0 %v5364_v56  ;;  %4328 = vmatpush1.bf16.msra.mxu1 %v5426_v39 }
 0x87f   :  { %4298 = vmatprep.subr.bf16.mxu0 %v5381_v1  ;;  %4330 = vmatprep.subr.bf16.mxu1 %v5432_v46 }
 0x882   :  { %4300 = vmatpush1.bf16.msra.mxu0 %v5386_v7  ;;  %4332 = vmatpush1.bf16.msra.mxu1 %v5447_v59 }
 0x883   :  { %4302 = vmatprep.subr.bf16.mxu0 %v5403_v16  ;;  %4334 = vmatprep.subr.bf16.mxu1 %v5453_v60 }
 0x886   :  { %4304 = vmatpush1.bf16.msra.mxu0 %v5407_v22  ;;  %4336 = vmatpush1.bf16.msra.mxu1 %v5465_v9 }
 0x887   :  { %4306 = vmatprep.subr.bf16.mxu0 %v5424_v38  ;;  %4338 = vmatprep.subr.bf16.mxu1 %v5469_v51 }
 0x88a   :  { %4308 = vmatpush1.bf16.msra.mxu0 %v5430_v43  ;;  %4340 = vmatpush1.bf16.msra.mxu1 %v5480_v21 }
 0x88b   :  { %4310 = vmatprep.subr.bf16.mxu0 %v5445_v58  ;;  %4342 = vmatprep.subr.bf16.mxu1 %v5484_v24 }
 0x88e   :  { %4312 = vmatpush1.bf16.msra.mxu0 %v5450_v41  ;;  %4344 = vmatpush1.bf16.msra.mxu1 %v5495_v30 }
 0x88f   :  { %4346 = vmatprep.subr.bf16.mxu0 %v5275_v19  ;;  %4378 = vmatprep.subr.bf16.mxu1 %v5277_v20 }
 0x944   :  { %v2092_v10 = vpop.f32.mrb[16].mxu0  ;;  %v2163_v13 = vpop.f32.mrb[24].mxu1 }
 0x945   :  { %v4771_v8 = vadd.f32 %v2092_v10, %v5584_v54  ;;  %v2094_v18 = vpop.f32.mrb[17].mxu0  ;;  %v2165_v25 = vpop.f32.mrb[25].mxu1  ;;  %v4811_v4 = vadd.f32 %v2163_v13, %v5590_v11 }
 0x946   :  { %v4772_v63 = vadd.f32 %v2094_v18, %v5582_v50  ;;  %v4812_v40 = vadd.f32 %v2165_v25, %v5592_v12 }
 0x947   :  { %v3628_v29 = vmul.f32 -1.442695, %v4771_v8  ;;  %v3630_v44 = vmul.f32 -1.442695, %v4811_v4 }
 0x948   :  { %v3629_v33 = vmul.f32 -1.442695, %v4772_v63 }
 0x949   :  { %5020 = vpow2.f32 %v3628_v29 }
 0x94a   :  { %5022 = vpow2.f32 %v3629_v33 }
 0x94b   :  { %5024 = vtanh.f32 %v4812_v40 }
 0x94c   :  { %5026 = vpow2.f32 %v3630_v44 }
 0x953   :  { %v5021_v55 = vpop.eup %5020 }
 0x954   :  { %v2181_v49 = vadd.f32 1.0, %v5021_v55  ;;  %v5023_v57 = vpop.eup %5022 }
 0x955   :  { %v2182_v47 = vadd.f32 1.0, %v5023_v57  ;;  %v5025_v2 = vpop.eup %5024 }
 0x956   :  { %5028 = vrcp.f32 %v2181_v49  ;;  %v5027_v61 = vpop.eup %5026 }
 0x957   :  { %5030 = vrcp.f32 %v2182_v47  ;;  %v2183_v18 = vadd.f32 1.0, %v5027_v61 }
 0x959   :  { %5032 = vrcp.f32 %v2183_v18 }
 0x960   :  { %v5029_v5 = vpop.eup %5028 }
 0x961   :  { %v2192_v10 = vmul.f32 %v5029_v5, %v5025_v2  ;;  %v5031_v8 = vpop.eup %5030 }
 0x962   :  { %v2191_v63 = vmul.f32 %v5031_v8, %v5890_v62 }
 0x963   :  { %v5033_v25 = vpop.eup %5032 }
 0x964   :  { %v5932_v13 = vadd.f32 %v2192_v10, %v2191_v63 }
 0x966   :  { %5034 = vtanh.f32 %v5932_v13 }
 0x970   :  { %v5035_v29 = vpop.eup %5034 }
 0x971   :  { %v2195_v33 = vmul.f32 %v5035_v29, %v5033_v25 }
 0x973   :  { %2268 = vmatmul.mubr.f32.vlgmr.msra.gmra.mrb[18].mxu0 %v2195_v33  ;;  %2339 = vmatmul.mubr.f32.vlgmr.msra.gmra.mrb[26].mxu1 %v2195_v33 }
 0x974   :  { %4348 = vmatpush1.bf16.msra.mxu0 %v5297_v27  ;;  %4380 = vmatpush1.bf16.msra.mxu1 %v5358_v52 }
 0x975   :  { %4350 = vmatprep.subr.bf16.mxu0 %v5301_v28  ;;  %4382 = vmatprep.subr.bf16.mxu1 %v5360_v53 }
 0x976   :  { %2444 = vmatprep.mubr.f32.mxu0 %v5202_v3  ;;  %2515 = vmatprep.mubr.f32.mxu1 %v5202_v3 }
 0x978   :  { %4352 = vmatpush1.bf16.msra.mxu0 %v5320_v35  ;;  %4384 = vmatpush1.bf16.msra.mxu1 %v5379_v0 }
 0x979   :  { %4354 = vmatprep.subr.bf16.mxu0 %v5323_v36  ;;  %4386 = vmatprep.subr.bf16.mxu1 %v5384_v6 }
 0x97c   :  { %4356 = vmatpush1.bf16.msra.mxu0 %v5342_v45  ;;  %4388 = vmatpush1.bf16.msra.mxu1 %v5401_v15 }
 0x97d   :  { %4358 = vmatprep.subr.bf16.mxu0 %v5345_v48  ;;  %4390 = vmatprep.subr.bf16.mxu1 %v5409_v23 }
 0x980   :  { %4360 = vmatpush1.bf16.msra.mxu0 %v5364_v56  ;;  %4392 = vmatpush1.bf16.msra.mxu1 %v5426_v39 }
 0x981   :  { %4362 = vmatprep.subr.bf16.mxu0 %v5381_v1  ;;  %4394 = vmatprep.subr.bf16.mxu1 %v5432_v46 }
 0x984   :  { %4364 = vmatpush1.bf16.msra.mxu0 %v5386_v7  ;;  %4396 = vmatpush1.bf16.msra.mxu1 %v5447_v59 }
 0x985   :  { %4366 = vmatprep.subr.bf16.mxu0 %v5403_v16  ;;  %4398 = vmatprep.subr.bf16.mxu1 %v5453_v60 }
 0x988   :  { %4368 = vmatpush1.bf16.msra.mxu0 %v5407_v22  ;;  %4400 = vmatpush1.bf16.msra.mxu1 %v5465_v9 }
 0x989   :  { %4370 = vmatprep.subr.bf16.mxu0 %v5424_v38  ;;  %4402 = vmatprep.subr.bf16.mxu1 %v5469_v51 }
 0x98c   :  { %4372 = vmatpush1.bf16.msra.mxu0 %v5430_v43  ;;  %4404 = vmatpush1.bf16.msra.mxu1 %v5480_v21 }
 0x98d   :  { %4374 = vmatprep.subr.bf16.mxu0 %v5445_v58  ;;  %4406 = vmatprep.subr.bf16.mxu1 %v5484_v24 }
 0x990   :  { %4376 = vmatpush1.bf16.msra.mxu0 %v5450_v41  ;;  %4408 = vmatpush1.bf16.msra.mxu1 %v5495_v30 }
 0x991   :  { %4410 = vmatprep.subr.bf16.mxu0 %v5275_v19  ;;  %4442 = vmatprep.subr.bf16.mxu1 %v5277_v20 }
 0xa46   :  { %v2269_v62 = vpop.f32.mrb[18].mxu0  ;;  %v2340_v4 = vpop.f32.mrb[26].mxu1 }
 0xa47   :  { %v4773_v40 = vadd.f32 %v2269_v62, %v5584_v54  ;;  %v2271_v44 = vpop.f32.mrb[19].mxu0  ;;  %v2342_v55 = vpop.f32.mrb[27].mxu1  ;;  %v4813_v2 = vadd.f32 %v2340_v4, %v5590_v11 }
 0xa48   :  { %v4774_v49 = vadd.f32 %v2271_v44, %v5582_v50  ;;  %v4814_v61 = vadd.f32 %v2342_v55, %v5592_v12 }
 0xa49   :  { %v3631_v57 = vmul.f32 -1.442695, %v4773_v40  ;;  %v3633_v5 = vmul.f32 -1.442695, %v4813_v2 }
 0xa4a   :  { %v3632_v47 = vmul.f32 -1.442695, %v4774_v49 }
 0xa4b   :  { %5036 = vpow2.f32 %v3631_v57 }
 0xa4c   :  { %5038 = vpow2.f32 %v3632_v47 }
 0xa4d   :  { %5040 = vtanh.f32 %v4814_v61 }
 0xa4e   :  { %5042 = vpow2.f32 %v3633_v5 }
 0xa55   :  { %v5037_v10 = vpop.eup %5036 }
 0xa56   :  { %v2358_v8 = vadd.f32 1.0, %v5037_v10  ;;  %v5039_v18 = vpop.eup %5038 }
 0xa57   :  { %v2359_v63 = vadd.f32 1.0, %v5039_v18  ;;  %v5041_v25 = vpop.eup %5040 }
 0xa58   :  { %5044 = vrcp.f32 %v2358_v8  ;;  %v5043_v29 = vpop.eup %5042 }
 0xa59   :  { %5046 = vrcp.f32 %v2359_v63  ;;  %v2360_v44 = vadd.f32 1.0, %v5043_v29 }
 0xa5b   :  { %5048 = vrcp.f32 %v2360_v44 }
 0xa62   :  { %v5045_v33 = vpop.eup %5044 }
 0xa63   :  { %v2369_v62 = vmul.f32 %v5045_v33, %v5041_v25  ;;  %v5047_v40 = vpop.eup %5046 }
 0xa64   :  { %v2368_v49 = vmul.f32 %v5047_v40, %v5932_v13 }
 0xa65   :  { %v5049_v55 = vpop.eup %5048 }
 0xa66   :  { %v5974_v4 = vadd.f32 %v2369_v62, %v2368_v49 }
 0xa68   :  { %5050 = vtanh.f32 %v5974_v4 }
 0xa72   :  { %v5051_v57 = vpop.eup %5050 }
 0xa73   :  { %v2372_v47 = vmul.f32 %v5051_v57, %v5049_v55 }
 0xa75   :  { %2445 = vmatmul.mubr.f32.vlgmr.msra.gmra.mrb[20].mxu0 %v2372_v47  ;;  %2516 = vmatmul.mubr.f32.vlgmr.msra.gmra.mrb[28].mxu1 %v2372_v47 }
 0xa76   :  { %4412 = vmatpush1.bf16.msra.mxu0 %v5297_v27  ;;  %4444 = vmatpush1.bf16.msra.mxu1 %v5358_v52 }
 0xa77   :  { %4414 = vmatprep.subr.bf16.mxu0 %v5301_v28  ;;  %4446 = vmatprep.subr.bf16.mxu1 %v5360_v53 }
 0xa78   :  { %2621 = vmatprep.mubr.f32.mxu0 %v5202_v3  ;;  %2692 = vmatprep.mubr.f32.mxu1 %v5202_v3 }
 0xa7a   :  { %4416 = vmatpush1.bf16.msra.mxu0 %v5320_v35  ;;  %4448 = vmatpush1.bf16.msra.mxu1 %v5379_v0 }
 0xa7b   :  { %4418 = vmatprep.subr.bf16.mxu0 %v5323_v36  ;;  %4450 = vmatprep.subr.bf16.mxu1 %v5384_v6 }
 0xa7e   :  { %4420 = vmatpush1.bf16.msra.mxu0 %v5342_v45  ;;  %4452 = vmatpush1.bf16.msra.mxu1 %v5401_v15 }
 0xa7f   :  { %4422 = vmatprep.subr.bf16.mxu0 %v5345_v48  ;;  %4454 = vmatprep.subr.bf16.mxu1 %v5409_v23 }
 0xa82   :  { %4424 = vmatpush1.bf16.msra.mxu0 %v5364_v56  ;;  %4456 = vmatpush1.bf16.msra.mxu1 %v5426_v39 }
 0xa83   :  { %4426 = vmatprep.subr.bf16.mxu0 %v5381_v1  ;;  %4458 = vmatprep.subr.bf16.mxu1 %v5432_v46 }
 0xa86   :  { %4428 = vmatpush1.bf16.msra.mxu0 %v5386_v7  ;;  %4460 = vmatpush1.bf16.msra.mxu1 %v5447_v59 }
 0xa87   :  { %4430 = vmatprep.subr.bf16.mxu0 %v5403_v16  ;;  %4462 = vmatprep.subr.bf16.mxu1 %v5453_v60 }
 0xa8a   :  { %4432 = vmatpush1.bf16.msra.mxu0 %v5407_v22  ;;  %4464 = vmatpush1.bf16.msra.mxu1 %v5465_v9 }
 0xa8b   :  { %4434 = vmatprep.subr.bf16.mxu0 %v5424_v38  ;;  %4466 = vmatprep.subr.bf16.mxu1 %v5469_v51 }
 0xa8e   :  { %4436 = vmatpush1.bf16.msra.mxu0 %v5430_v43  ;;  %4468 = vmatpush1.bf16.msra.mxu1 %v5480_v21 }
 0xa8f   :  { %4438 = vmatprep.subr.bf16.mxu0 %v5445_v58  ;;  %4470 = vmatprep.subr.bf16.mxu1 %v5484_v24 }
 0xa92   :  { %4440 = vmatpush1.bf16.msra.mxu0 %v5450_v41  ;;  %4472 = vmatpush1.bf16.msra.mxu1 %v5495_v30 }
 0xa93   :  { %4474 = vmatprep.subr.bf16.mxu0 %v5275_v19  ;;  %4506 = vmatprep.subr.bf16.mxu1 %v5277_v20 }
 0xb48   :  { %v2446_v13 = vpop.f32.mrb[20].mxu0  ;;  %v2517_v2 = vpop.f32.mrb[28].mxu1 }
 0xb49   :  { %v4775_v61 = vadd.f32 %v2446_v13, %v5584_v54  ;;  %v2448_v5 = vpop.f32.mrb[21].mxu0  ;;  %v2519_v10 = vpop.f32.mrb[29].mxu1  ;;  %v4815_v25 = vadd.f32 %v2517_v2, %v5590_v11 }
 0xb4a   :  { %v4776_v8 = vadd.f32 %v2448_v5, %v5582_v50  ;;  %v4816_v29 = vadd.f32 %v2519_v10, %v5592_v12 }
 0xb4b   :  { %v3634_v18 = vmul.f32 -1.442695, %v4775_v61  ;;  %v3636_v33 = vmul.f32 -1.442695, %v4815_v25 }
 0xb4c   :  { %v3635_v63 = vmul.f32 -1.442695, %v4776_v8 }
 0xb4d   :  { %5052 = vpow2.f32 %v3634_v18 }
 0xb4e   :  { %5054 = vpow2.f32 %v3635_v63 }
 0xb4f   :  { %5056 = vtanh.f32 %v4816_v29 }
 0xb50   :  { %5058 = vpow2.f32 %v3636_v33 }
 0xb57   :  { %v5053_v62 = vpop.eup %5052 }
 0xb58   :  { %v2535_v40 = vadd.f32 1.0, %v5053_v62  ;;  %v5055_v44 = vpop.eup %5054 }
 0xb59   :  { %v2536_v49 = vadd.f32 1.0, %v5055_v44  ;;  %v5057_v55 = vpop.eup %5056 }
 0xb5a   :  { %5060 = vrcp.f32 %v2535_v40  ;;  %v5059_v57 = vpop.eup %5058 }
 0xb5b   :  { %5062 = vrcp.f32 %v2536_v49  ;;  %v2537_v5 = vadd.f32 1.0, %v5059_v57 }
 0xb5d   :  { %5064 = vrcp.f32 %v2537_v5 }
 0xb64   :  { %v5061_v47 = vpop.eup %5060 }
 0xb65   :  { %v2546_v13 = vmul.f32 %v5061_v47, %v5057_v55  ;;  %v5063_v61 = vpop.eup %5062 }
 0xb66   :  { %v2545_v8 = vmul.f32 %v5063_v61, %v5974_v4 }
 0xb67   :  { %v5065_v10 = vpop.eup %5064 }
 0xb68   :  { %v6016_v2 = vadd.f32 %v2546_v13, %v2545_v8 }
 0xb6a   :  { %5066 = vtanh.f32 %v6016_v2 }
 0xb74   :  { %v5067_v18 = vpop.eup %5066 }
 0xb75   :  { %v2549_v63 = vmul.f32 %v5067_v18, %v5065_v10 }
 0xb77   :  { %2622 = vmatmul.mubr.f32.vlgmr.msra.gmra.mrb[22].mxu0 %v2549_v63  ;;  %2693 = vmatmul.mubr.f32.vlgmr.msra.gmra.mrb[30].mxu1 %v2549_v63 }
 0xb78   :  { %4476 = vmatpush1.bf16.msra.mxu0 %v5297_v27  ;;  %4508 = vmatpush1.bf16.msra.mxu1 %v5358_v52 }
 0xb79   :  { %4478 = vmatprep.subr.bf16.mxu0 %v5301_v28  ;;  %4510 = vmatprep.subr.bf16.mxu1 %v5360_v53 }
 0xb7a   :  { %2798 = vmatprep.mubr.f32.mxu0 %v5202_v3  ;;  %2869 = vmatprep.mubr.f32.mxu1 %v5202_v3 }
 0xb7c   :  { %4480 = vmatpush1.bf16.msra.mxu0 %v5320_v35  ;;  %4512 = vmatpush1.bf16.msra.mxu1 %v5379_v0 }
 0xb7d   :  { %4482 = vmatprep.subr.bf16.mxu0 %v5323_v36  ;;  %4514 = vmatprep.subr.bf16.mxu1 %v5384_v6 }
 0xb80   :  { %4484 = vmatpush1.bf16.msra.mxu0 %v5342_v45  ;;  %4516 = vmatpush1.bf16.msra.mxu1 %v5401_v15 }
 0xb81   :  { %4486 = vmatprep.subr.bf16.mxu0 %v5345_v48  ;;  %4518 = vmatprep.subr.bf16.mxu1 %v5409_v23 }
 0xb84   :  { %4488 = vmatpush1.bf16.msra.mxu0 %v5364_v56  ;;  %4520 = vmatpush1.bf16.msra.mxu1 %v5426_v39 }
 0xb85   :  { %4490 = vmatprep.subr.bf16.mxu0 %v5381_v1  ;;  %4522 = vmatprep.subr.bf16.mxu1 %v5432_v46 }
 0xb88   :  { %4492 = vmatpush1.bf16.msra.mxu0 %v5386_v7  ;;  %4524 = vmatpush1.bf16.msra.mxu1 %v5447_v59 }
 0xb89   :  { %4494 = vmatprep.subr.bf16.mxu0 %v5403_v16  ;;  %4526 = vmatprep.subr.bf16.mxu1 %v5453_v60 }
 0xb8c   :  { %4496 = vmatpush1.bf16.msra.mxu0 %v5407_v22  ;;  %4528 = vmatpush1.bf16.msra.mxu1 %v5465_v9 }
 0xb8d   :  { %4498 = vmatprep.subr.bf16.mxu0 %v5424_v38  ;;  %4530 = vmatprep.subr.bf16.mxu1 %v5469_v51 }
 0xb90   :  { %4500 = vmatpush1.bf16.msra.mxu0 %v5430_v43  ;;  %4532 = vmatpush1.bf16.msra.mxu1 %v5480_v21 }
 0xb91   :  { %4502 = vmatprep.subr.bf16.mxu0 %v5445_v58  ;;  %4534 = vmatprep.subr.bf16.mxu1 %v5484_v24 }
 0xb94   :  { %4504 = vmatpush1.bf16.msra.mxu0 %v5450_v41  ;;  %4536 = vmatpush1.bf16.msra.mxu1 %v5495_v30 }
 0xb95   :  { %4538 = vmatprep.subr.bf16.mxu0 %v5275_v19  ;;  %4570 = vmatprep.subr.bf16.mxu1 %v5277_v20 }
 0xc4a   :  { %v2623_v4 = vpop.f32.mrb[22].mxu0  ;;  %v2694_v25 = vpop.f32.mrb[30].mxu1 }
 0xc4b   :  { %v4777_v29 = vadd.f32 %v2623_v4, %v5584_v54  ;;  %v2625_v33 = vpop.f32.mrb[23].mxu0  ;;  %v2696_v62 = vpop.f32.mrb[31].mxu1  ;;  %v4817_v55 = vadd.f32 %v2694_v25, %v5590_v11 }
 0xc4c   :  { %v4778_v40 = vadd.f32 %v2625_v33, %v5582_v50  ;;  %v4818_v57 = vadd.f32 %v2696_v62, %v5592_v12 }
 0xc4d   :  { %v3637_v44 = vmul.f32 -1.442695, %v4777_v29  ;;  %v3639_v47 = vmul.f32 -1.442695, %v4817_v55  ;;  %v294_v55 = vadd.f32 %v5563_v26, %v5582_v50 }
 0xc4e   :  { %v3638_v49 = vmul.f32 -1.442695, %v4778_v40 }
 0xc4f   :  { %5068 = vpow2.f32 %v3637_v44 }
 0xc50   :  { %5070 = vpow2.f32 %v3638_v49 }
 0xc51   :  { %5072 = vtanh.f32 %v4818_v57 }
 0xc52   :  { %5074 = vpow2.f32 %v3639_v47 }
 0xc59   :  { %v5069_v13 = vpop.eup %5068 }
 0xc5a   :  { %v2712_v61 = vadd.f32 1.0, %v5069_v13  ;;  %v5071_v5 = vpop.eup %5070 }
 0xc5b   :  { %v2713_v8 = vadd.f32 1.0, %v5071_v5  ;;  %v5073_v10 = vpop.eup %5072 }
 0xc5c   :  { %5076 = vrcp.f32 %v2712_v61  ;;  %v5075_v18 = vpop.eup %5074 }
 0xc5d   :  { %5078 = vrcp.f32 %v2713_v8  ;;  %v2714_v33 = vadd.f32 1.0, %v5075_v18 }
 0xc5f   :  { %5080 = vrcp.f32 %v2714_v33 }
 0xc66   :  { %v5077_v63 = vpop.eup %5076 }
 0xc67   :  { %v2723_v4 = vmul.f32 %v5077_v63, %v5073_v10  ;;  %v5079_v29 = vpop.eup %5078 }
 0xc68   :  { %v2722_v40 = vmul.f32 %v5079_v29, %v6016_v2  ;;  %v292_v2 = vadd.f32 %v5561_v17, %v5584_v54 }
 0xc69   :  { %v5081_v62 = vpop.eup %5080 }
 0xc6a   :  { %v6058_v25 = vadd.f32 %v2723_v4, %v2722_v40 }
 0xc6c   :  { %5082 = vtanh.f32 %v6058_v25 }
 0xc76   :  { %v5083_v44 = vpop.eup %5082 }
 0xc77   :  { %v2726_v49 = vmul.f32 %v5083_v44, %v5081_v62 }
 0xc79   :  { %2799 = vmatmul.mubr.f32.vlgmr.msra.gmra.mrb[24].mxu0 %v2726_v49  ;;  %2870 = vmatmul.mubr.f32.vlgmr.msra.gmra.mrb[32].mxu1 %v2726_v49 }
 0xc7a   :  { %4540 = vmatpush1.bf16.msra.mxu0 %v5297_v27  ;;  %4572 = vmatpush1.bf16.msra.mxu1 %v5358_v52 }
 0xc7b   :  { %4542 = vmatprep.subr.bf16.mxu0 %v5301_v28  ;;  %4574 = vmatprep.subr.bf16.mxu1 %v5360_v53 }
 0xc7c   :  { %2975 = vmatprep.mubr.f32.mxu0 %v5202_v3  ;;  %3046 = vmatprep.mubr.f32.mxu1 %v5202_v3 }
 0xc7e   :  { %4544 = vmatpush1.bf16.msra.mxu0 %v5320_v35  ;;  %4576 = vmatpush1.bf16.msra.mxu1 %v5379_v0 }
 0xc7f   :  { %4546 = vmatprep.subr.bf16.mxu0 %v5323_v36  ;;  %4578 = vmatprep.subr.bf16.mxu1 %v5384_v6 }
 0xc82   :  { %4548 = vmatpush1.bf16.msra.mxu0 %v5342_v45  ;;  %4580 = vmatpush1.bf16.msra.mxu1 %v5401_v15 }
 0xc83   :  { %4550 = vmatprep.subr.bf16.mxu0 %v5345_v48  ;;  %4582 = vmatprep.subr.bf16.mxu1 %v5409_v23 }
 0xc86   :  { %4552 = vmatpush1.bf16.msra.mxu0 %v5364_v56  ;;  %4584 = vmatpush1.bf16.msra.mxu1 %v5426_v39 }
 0xc87   :  { %4554 = vmatprep.subr.bf16.mxu0 %v5381_v1  ;;  %4586 = vmatprep.subr.bf16.mxu1 %v5432_v46 }
 0xc8a   :  { %4556 = vmatpush1.bf16.msra.mxu0 %v5386_v7  ;;  %4588 = vmatpush1.bf16.msra.mxu1 %v5447_v59 }
 0xc8b   :  { %4558 = vmatprep.subr.bf16.mxu0 %v5403_v16  ;;  %4590 = vmatprep.subr.bf16.mxu1 %v5453_v60 }
 0xc8e   :  { %4560 = vmatpush1.bf16.msra.mxu0 %v5407_v22  ;;  %4592 = vmatpush1.bf16.msra.mxu1 %v5465_v9 }
 0xc8f   :  { %4562 = vmatprep.subr.bf16.mxu0 %v5424_v38  ;;  %4594 = vmatprep.subr.bf16.mxu1 %v5469_v51 }
 0xc92   :  { %4564 = vmatpush1.bf16.msra.mxu0 %v5430_v43  ;;  %4596 = vmatpush1.bf16.msra.mxu1 %v5480_v21 }
 0xc93   :  { %4566 = vmatprep.subr.bf16.mxu0 %v5445_v58  ;;  %4598 = vmatprep.subr.bf16.mxu1 %v5484_v24 }
 0xc96   :  { %4568 = vmatpush1.bf16.msra.mxu0 %v5450_v41  ;;  %4600 = vmatpush1.bf16.msra.mxu1 %v5495_v30 }
 0xc97   :  { %4602 = vmatprep.subr.bf16.mxu0 %v5275_v19  ;;  %4634 = vmatprep.subr.bf16.mxu1 %v5277_v20 }
 0xd4c   :  { %v2800_v57 = vpop.f32.mrb[24].mxu0  ;;  %v2871_v47 = vpop.f32.mrb[32].mxu1 }
 0xd4d   :  { %v2876_v13 = vadd.f32 %v2800_v57, %v292_v2  ;;  %v2802_v61 = vpop.f32.mrb[25].mxu0  ;;  %v2873_v5 = vpop.f32.mrb[33].mxu1  ;;  %v4819_v63 = vadd.f32 %v2871_v47, %v5590_v11 }
 0xd4e   :  { %v2877_v8 = vadd.f32 %v2802_v61, %v294_v55  ;;  %v4820_v4 = vadd.f32 %v2873_v5, %v5592_v12 }
 0xd4f   :  { %v3640_v10 = vmul.f32 -1.442695, %v2876_v13  ;;  %v3642_v29 = vmul.f32 -1.442695, %v4819_v63 }
 0xd50   :  { %v3641_v18 = vmul.f32 -1.442695, %v2877_v8 }
 0xd51   :  { %5084 = vpow2.f32 %v3640_v10  ;;  %v300_v10 = vadd.f32 %v5567_v42, %v5582_v50 }
 0xd52   :  { %5086 = vpow2.f32 %v3641_v18 }
 0xd53   :  { %5088 = vtanh.f32 %v4820_v4 }
 0xd54   :  { %5090 = vpow2.f32 %v3642_v29 }
 0xd5b   :  { %v5085_v33 = vpop.eup %5084 }
 0xd5c   :  { %v2889_v17 = vadd.f32 1.0, %v5085_v33  ;;  %v5087_v40 = vpop.eup %5086 }
 0xd5d   :  { %v2890_v26 = vadd.f32 1.0, %v5087_v40  ;;  %v5089_v62 = vpop.eup %5088 }
 0xd5e   :  { %5092 = vrcp.f32 %v2889_v17  ;;  %v5091_v44 = vpop.eup %5090 }
 0xd5f   :  { %5094 = vrcp.f32 %v2890_v26  ;;  %v2891_v57 = vadd.f32 1.0, %v5091_v44 }
 0xd61   :  { %5096 = vrcp.f32 %v2891_v57 }
 0xd68   :  { %v5093_v49 = vpop.eup %5092 }
 0xd69   :  { %v2900_v2 = vmul.f32 %v5093_v49, %v5089_v62  ;;  %v5095_v55 = vpop.eup %5094 }
 0xd6a   :  { %v2899_v13 = vmul.f32 %v5095_v55, %v6058_v25  ;;  %v298_v25 = vadd.f32 %v5565_v34, %v5584_v54 }
 0xd6b   :  { %v5097_v61 = vpop.eup %5096 }
 0xd6c   :  { %v6102_v47 = vadd.f32 %v2900_v2, %v2899_v13 }
 0xd6e   :  { %5098 = vtanh.f32 %v6102_v47 }
 0xd78   :  { %v5099_v5 = vpop.eup %5098 }
 0xd79   :  { %v2903_v8 = vmul.f32 %v5099_v5, %v5097_v61 }
 0xd7b   :  { %2976 = vmatmul.mubr.f32.vlgmr.msra.gmra.mrb[26].mxu0 %v2903_v8  ;;  %3047 = vmatmul.mubr.f32.vlgmr.msra.gmra.mrb[34].mxu1 %v2903_v8 }
 0xd7c   :  { %4604 = vmatpush1.bf16.msra.mxu0 %v5297_v27  ;;  %4636 = vmatpush1.bf16.msra.mxu1 %v5358_v52 }
 0xd7d   :  { %4606 = vmatprep.subr.bf16.mxu0 %v5301_v28  ;;  %4638 = vmatprep.subr.bf16.mxu1 %v5360_v53 }
 0xd7e   :  { %3152 = vmatprep.mubr.f32.mxu0 %v5202_v3  ;;  %3223 = vmatprep.mubr.f32.mxu1 %v5202_v3 }
 0xd80   :  { %4608 = vmatpush1.bf16.msra.mxu0 %v5320_v35  ;;  %4640 = vmatpush1.bf16.msra.mxu1 %v5379_v0 }
 0xd81   :  { %4610 = vmatprep.subr.bf16.mxu0 %v5323_v36  ;;  %4642 = vmatprep.subr.bf16.mxu1 %v5384_v6 }
 0xd84   :  { %4612 = vmatpush1.bf16.msra.mxu0 %v5342_v45  ;;  %4644 = vmatpush1.bf16.msra.mxu1 %v5401_v15 }
 0xd85   :  { %4614 = vmatprep.subr.bf16.mxu0 %v5345_v48  ;;  %4646 = vmatprep.subr.bf16.mxu1 %v5409_v23 }
 0xd88   :  { %4616 = vmatpush1.bf16.msra.mxu0 %v5364_v56  ;;  %4648 = vmatpush1.bf16.msra.mxu1 %v5426_v39 }
 0xd89   :  { %4618 = vmatprep.subr.bf16.mxu0 %v5381_v1  ;;  %4650 = vmatprep.subr.bf16.mxu1 %v5432_v46 }
 0xd8c   :  { %4620 = vmatpush1.bf16.msra.mxu0 %v5386_v7  ;;  %4652 = vmatpush1.bf16.msra.mxu1 %v5447_v59 }
 0xd8d   :  { %4622 = vmatprep.subr.bf16.mxu0 %v5403_v16  ;;  %4654 = vmatprep.subr.bf16.mxu1 %v5453_v60 }
 0xd90   :  { %4624 = vmatpush1.bf16.msra.mxu0 %v5407_v22  ;;  %4656 = vmatpush1.bf16.msra.mxu1 %v5465_v9 }
 0xd91   :  { %4626 = vmatprep.subr.bf16.mxu0 %v5424_v38  ;;  %4658 = vmatprep.subr.bf16.mxu1 %v5469_v51 }
 0xd94   :  { %4628 = vmatpush1.bf16.msra.mxu0 %v5430_v43  ;;  %4660 = vmatpush1.bf16.msra.mxu1 %v5480_v21 }
 0xd95   :  { %4630 = vmatprep.subr.bf16.mxu0 %v5445_v58  ;;  %4662 = vmatprep.subr.bf16.mxu1 %v5484_v24 }
 0xd98   :  { %4632 = vmatpush1.bf16.msra.mxu0 %v5450_v41  ;;  %4664 = vmatpush1.bf16.msra.mxu1 %v5495_v30 }
 0xd99   :  { %4666 = vmatprep.subr.bf16.mxu0 %v5275_v19  ;;  %4698 = vmatprep.subr.bf16.mxu1 %v5277_v20 }
 0xe4e   :  { %v2977_v18 = vpop.f32.mrb[26].mxu0  ;;  %v3048_v63 = vpop.f32.mrb[34].mxu1 }
 0xe4f   :  { %v3053_v4 = vadd.f32 %v2977_v18, %v298_v25  ;;  %v2979_v29 = vpop.f32.mrb[27].mxu0  ;;  %v3050_v33 = vpop.f32.mrb[35].mxu1  ;;  %v4821_v19 = vadd.f32 %v3048_v63, %v5590_v11 }
 0xe50   :  { %v3054_v17 = vadd.f32 %v2979_v29, %v300_v10  ;;  %v4822_v20 = vadd.f32 %v3050_v33, %v5592_v12  ;;  %v3439_v33 = vld [vmem:[%s6266_s4 + $0x20] sm:$0xff] }
 0xe51   :  { %v3643_v40 = vmul.f32 -1.442695, %v3053_v4  ;;  %v3645_v62 = vmul.f32 -1.442695, %v4821_v19  ;;  %v3438_v4 = vld [vmem:[%s6266_s4 + $0x18] sm:$0xff] }
 0xe52   :  { %v3644_v26 = vmul.f32 -1.442695, %v3054_v17  ;;  %v3440_v17 = vld [vmem:[%s6266_s4 + $0x28] sm:$0xff]  ;;  %v3442_v19 = vld [vmem:[%s6266_s4 + $0x38] sm:$0xff] }
 0xe53   :  { %5100 = vpow2.f32 %v3643_v40  ;;  %v4736_v40 = vpack.c.bf16 %v3440_v17, %v3439_v33 }
 0xe54   :  { %5102 = vpow2.f32 %v3644_v26  ;;  %v3441_v26 = vld [vmem:[%s6266_s4 + $0x30] sm:$0xff] }
 0xe55   :  { %5104 = vtanh.f32 %v4822_v20  ;;  %v4739_v20 = vpack.c.bf16 %v3442_v19, %v3441_v26 }
 0xe56   :  { %5106 = vpow2.f32 %v3645_v62  ;;  %v3443_v62 = vld [vmem:[%s6266_s4 + $0x40] sm:$0xff] }
 0xe5d   :  { %v5101_v44 = vpop.eup %5100 }
 0xe5e   :  { %v3066_v34 = vadd.f32 1.0, %v5101_v44  ;;  %v5103_v49 = vpop.eup %5102  ;;  %v3444_v44 = vld [vmem:[%s6266_s4 + $0x48] sm:$0xff] }
 0xe5f   :  { %v3067_v42 = vadd.f32 1.0, %v5103_v49  ;;  %v5105_v2 = vpop.eup %5104  ;;  %v3445_v49 = vld [vmem:[%s6266_s4 + $0x50] sm:$0xff] }
 0xe60   :  { %5108 = vrcp.f32 %v3066_v34  ;;  %v5107_v55 = vpop.eup %5106  ;;  %v4742_v34 = vpack.c.bf16 %v3444_v44, %v3443_v62 }
 0xe61   :  { %5110 = vrcp.f32 %v3067_v42  ;;  %v3068_v5 = vadd.f32 1.0, %v5107_v55  ;;  %v3446_v42 = vld [vmem:[%s6266_s4 + $0x58] sm:$0xff]  ;;  %v3447_v55 = vld [vmem:[%s6266_s4 + $0x60] sm:$0xff] }
 0xe63   :  { %5112 = vrcp.f32 %v3068_v5  ;;  %v3450_v5 = vld [vmem:[%s6266_s4 + $0x78] sm:$0xff] }
 0xe6a   :  { %v5109_v57 = vpop.eup %5108 }
 0xe6b   :  { %v3077_v13 = vmul.f32 %v5109_v57, %v5105_v2  ;;  %v5111_v61 = vpop.eup %5110  ;;  %v4745_v2 = vpack.c.bf16 %v3446_v42, %v3445_v49  ;;  %v3448_v57 = vld [vmem:[%s6266_s4 + $0x68] sm:$0xff] }
 0xe6c   :  { %v3076_v8 = vmul.f32 %v5111_v61, %v6102_v47  ;;  %v3437_v47 = vld [vmem:[%s6266_s4 + $0x10] sm:$0xff] }
 0xe6d   :  { %v5113_v10 = vpop.eup %5112  ;;  %v4733_v29 = vpack.c.bf16 %v3438_v4, %v3437_v47  ;;  %v3449_v61 = vld [vmem:[%s6266_s4 + $0x70] sm:$0xff] }
 0xe6e   :  { %v6146_v25 = vadd.f32 %v3077_v13, %v3076_v8  ;;  %v4748_v13 = vpack.c.bf16 %v3448_v57, %v3447_v55  ;;  %v4751_v8 = vpack.c.bf16 %v3450_v5, %v3449_v61 }
 0xe70   :  { %5114 = vtanh.f32 %v6146_v25 }
 0xe7a   :  { %v5115_v18 = vpop.eup %5114 }
 0xe7b   :  { %v3080_v63 = vmul.f32 %v5115_v18, %v5113_v10 }
 0xe7d   :  { %3153 = vmatmul.mubr.f32.vlgmr.msra.gmra.mrb[28].mxu0 %v3080_v63  ;;  %3224 = vmatmul.mubr.f32.vlgmr.msra.gmra.mrb[36].mxu1 %v3080_v63 }
 0xe7e   :  { %4668 = vmatpush1.bf16.msra.mxu0 %v5297_v27  ;;  %4700 = vmatpush1.bf16.msra.mxu1 %v5358_v52  ;;  %v304_v27 = vadd.f32 %v5569_v14, %v5584_v54 }
 0xe7f   :  { %4670 = vmatprep.subr.bf16.mxu0 %v5301_v28  ;;  %4702 = vmatprep.subr.bf16.mxu1 %v5360_v53  ;;  %v306_v28 = vadd.f32 %v5571_v31, %v5582_v50  ;;  %v5203_v31 = vmov 0.0|0.0  }
 0xe80   :  { %3329 = vmatprep.mubr.f32.mxu0 %v5202_v3  ;;  %3400 = vmatprep.mubr.f32.mxu1 %v5202_v3 }
 0xe82   :  { %4672 = vmatpush1.bf16.msra.mxu0 %v5320_v35  ;;  %4704 = vmatpush1.bf16.msra.mxu1 %v5379_v0 }
 0xe83   :  { %4674 = vmatprep.subr.bf16.mxu0 %v5323_v36  ;;  %4706 = vmatprep.subr.bf16.mxu1 %v5384_v6 }
 0xe86   :  { %4676 = vmatpush1.bf16.msra.mxu0 %v5342_v45  ;;  %4708 = vmatpush1.bf16.msra.mxu1 %v5401_v15 }
 0xe87   :  { %4678 = vmatprep.subr.bf16.mxu0 %v5345_v48  ;;  %4710 = vmatprep.subr.bf16.mxu1 %v5409_v23 }
 0xe8a   :  { %4680 = vmatpush1.bf16.msra.mxu0 %v5364_v56  ;;  %4712 = vmatpush1.bf16.msra.mxu1 %v5426_v39 }
 0xe8b   :  { %4682 = vmatprep.subr.bf16.mxu0 %v5381_v1  ;;  %4714 = vmatprep.subr.bf16.mxu1 %v5432_v46 }
 0xe8e   :  { %4684 = vmatpush1.bf16.msra.mxu0 %v5386_v7  ;;  %4716 = vmatpush1.bf16.msra.mxu1 %v5447_v59 }
 0xe8f   :  { %4686 = vmatprep.subr.bf16.mxu0 %v5403_v16  ;;  %4718 = vmatprep.subr.bf16.mxu1 %v5453_v60 }
 0xe92   :  { %4688 = vmatpush1.bf16.msra.mxu0 %v5407_v22  ;;  %4720 = vmatpush1.bf16.msra.mxu1 %v5465_v9 }
 0xe93   :  { %4690 = vmatprep.subr.bf16.mxu0 %v5424_v38  ;;  %4722 = vmatprep.subr.bf16.mxu1 %v5469_v51 }
 0xe96   :  { %4692 = vmatpush1.bf16.msra.mxu0 %v5430_v43  ;;  %4724 = vmatpush1.bf16.msra.mxu1 %v5480_v21 }
 0xe97   :  { %4694 = vmatprep.subr.bf16.mxu0 %v5445_v58  ;;  %4726 = vmatprep.subr.bf16.mxu1 %v5484_v24  ;;  %v3435_v24 = vld [vmem:[%s6266_s4] sm:$0xff] }
 0xe9a   :  { %4696 = vmatpush1.bf16.msra.mxu0 %v5450_v41  ;;  %4728 = vmatpush1.bf16.msra.mxu1 %v5495_v30  ;;  %v3436_v30 = vld [vmem:[%s6266_s4 + $0x8] sm:$0xff] }
 0xe9b   :  { %v4730_v14 = vpack.c.bf16 %v3436_v30, %v3435_v24  ;;  %4729 = vmatprep.subr.bf16.mxu0 %v5203_v31 }
 0xf50   :  { %v3154_v35 = vpop.f32.mrb[28].mxu0  ;;  %v3225_v36 = vpop.f32.mrb[36].mxu1 }
 0xf51   :  { %v3230_v45 = vadd.f32 %v3154_v35, %v304_v27  ;;  %v3156_v48 = vpop.f32.mrb[29].mxu0  ;;  %v3227_v52 = vpop.f32.mrb[37].mxu1  ;;  %v4823_v1 = vadd.f32 %v3225_v36, %v5590_v11 }
 0xf52   :  { %v3231_v53 = vadd.f32 %v3156_v48, %v306_v28  ;;  %v4824_v6 = vadd.f32 %v3227_v52, %v5592_v12 }
 0xf53   :  { %v3646_v56 = vmul.f32 -1.442695, %v3230_v45  ;;  %v3648_v7 = vmul.f32 -1.442695, %v4823_v1 }
 0xf54   :  { %v3647_v0 = vmul.f32 -1.442695, %v3231_v53 }
 0xf55   :  { %5116 = vpow2.f32 %v3646_v56 }
 0xf56   :  { %5118 = vpow2.f32 %v3647_v0 }
 0xf57   :  { %5120 = vtanh.f32 %v4824_v6 }
 0xf58   :  { %5122 = vpow2.f32 %v3648_v7 }
 0xf5f   :  { %v5117_v15 = vpop.eup %5116 }
 0xf60   :  { %v3243_v16 = vadd.f32 1.0, %v5117_v15  ;;  %v5119_v22 = vpop.eup %5118 }
 0xf61   :  { %v3244_v23 = vadd.f32 1.0, %v5119_v22  ;;  %v5121_v38 = vpop.eup %5120 }
 0xf62   :  { %5124 = vrcp.f32 %v3243_v16  ;;  %v5123_v39 = vpop.eup %5122 }
 0xf63   :  { %5126 = vrcp.f32 %v3244_v23  ;;  %v3245_v59 = vadd.f32 1.0, %v5123_v39 }
 0xf65   :  { %5128 = vrcp.f32 %v3245_v59 }
 0xf6c   :  { %v5125_v43 = vpop.eup %5124 }
 0xf6d   :  { %v3254_v46 = vmul.f32 %v5125_v43, %v5121_v38  ;;  %v5127_v58 = vpop.eup %5126  ;;  %v3652_v38 = vld [vmem:[%s6267_s5] ss:$0 sm:$0xff] }
 0xf6e   :  { %v3253_v41 = vmul.f32 %v5127_v58, %v6146_v25  ;;  %v310_v25 = vadd.f32 %v5573_v32, %v5584_v54 }
 0xf6f   :  { %v5129_v9 = vpop.eup %5128 }
 0xf70   :  { %v6188_v60 = vadd.f32 %v3254_v46, %v3253_v41 }
 0xf72   :  { %5130 = vtanh.f32 %v6188_v60 }
 0xf7c   :  { %v5131_v51 = vpop.eup %5130 }
 0xf7d   :  { %v3257_v21 = vmul.f32 %v5131_v51, %v5129_v9 }
 0xf7f   :  { %3330 = vmatmul.mubr.f32.vlgmr.msra.gmra.mrb[30].mxu0 %v3257_v21  ;;  %3401 = vmatmul.mubr.f32.vlgmr.msra.gmra.mrb[38].mxu1 %v3257_v21 }
 0xf80   :  { %4731 = vmatpush3.bf16.msra.mxu0 %v4730_v14  ;;  %3702 = vmatprep.mubr.msk.f32.mxu0 %vm5204_vm2, %v5202_v3  ;;  %v312_v3 = vadd.f32 %v5575_v37, %v5582_v50 }
 0xf81   :  { %4732 = vmatprep.subr.bf16.mxu0 %v5203_v31 }
 0xf84   :  { %4734 = vmatpush3.bf16.msra.mxu0 %v4733_v29 }
 0xf85   :  { %4735 = vmatprep.subr.bf16.mxu0 %v5203_v31 }
 0xf88   :  { %4737 = vmatpush3.bf16.msra.mxu0 %v4736_v40 }
 0xf89   :  { %4738 = vmatprep.subr.bf16.mxu0 %v5203_v31 }
 0xf8c   :  { %4740 = vmatpush3.bf16.msra.mxu0 %v4739_v20 }
 0xf8d   :  { %4741 = vmatprep.subr.bf16.mxu0 %v5203_v31 }
 0xf90   :  { %4743 = vmatpush3.bf16.msra.mxu0 %v4742_v34 }
 0xf91   :  { %4744 = vmatprep.subr.bf16.mxu0 %v5203_v31 }
 0xf94   :  { %4746 = vmatpush3.bf16.msra.mxu0 %v4745_v2 }
 0xf95   :  { %4747 = vmatprep.subr.bf16.mxu0 %v5203_v31 }
 0xf98   :  { %4749 = vmatpush3.bf16.msra.mxu0 %v4748_v13 }
 0xf99   :  { %4750 = vmatprep.subr.bf16.mxu0 %v5203_v31 }
 0xf9c   :  { %4752 = vmatpush3.bf16.msra.mxu0 %v4751_v8 }
0x1052   :  { %v3331_v10 = vpop.f32.mrb[30].mxu0  ;;  %v3402_v18 = vpop.f32.mrb[38].mxu1 }
0x1053   :  { %v3407_v63 = vadd.f32 %v3331_v10, %v310_v25  ;;  %v3333_v27 = vpop.f32.mrb[31].mxu0  ;;  %v3404_v28 = vpop.f32.mrb[39].mxu1  ;;  %v4825_v48 = vadd.f32 %v3402_v18, %v5590_v11 }
0x1054   :  { %v3408_v35 = vadd.f32 %v3333_v27, %v312_v3  ;;  %v4826_v52 = vadd.f32 %v3404_v28, %v5592_v12 }
0x1055   :  { %v3649_v36 = vmul.f32 -1.442695, %v3407_v63  ;;  %v3651_v53 = vmul.f32 -1.442695, %v4825_v48 }
0x1056   :  { %v3650_v45 = vmul.f32 -1.442695, %v3408_v35 }
0x1057   :  { %5132 = vpow2.f32 %v3649_v36 }
0x1058   :  { %5134 = vpow2.f32 %v3650_v45 }
0x1059   :  { %5136 = vtanh.f32 %v4826_v52 }
0x105a   :  { %5138 = vpow2.f32 %v3651_v53 }
0x1061   :  { %v5133_v56 = vpop.eup %5132 }
0x1062   :  { %v3420_v32 = vadd.f32 1.0, %v5133_v56  ;;  %v5135_v54 = vpop.eup %5134 }
0x1063   :  { %v3421_v37 = vadd.f32 1.0, %v5135_v54  ;;  %v5137_v50 = vpop.eup %5136 }
0x1064   :  { %5140 = vrcp.f32 %v3420_v32  ;;  %v5139_v0 = vpop.eup %5138 }
0x1065   :  { %5142 = vrcp.f32 %v3421_v37  ;;  %v3422_v15 = vadd.f32 1.0, %v5139_v0 }
0x1067   :  { %5144 = vrcp.f32 %v3422_v15 }
0x106e   :  { %v5141_v1 = vpop.eup %5140 }
0x106f   :  { %v3431_v6 = vmul.f32 %v5141_v1, %v5137_v50  ;;  %v5143_v7 = vpop.eup %5142 }
0x1070   :  { %v3430_v16 = vmul.f32 %v5143_v7, %v6188_v60 }
0x1071   :  { %v5145_v12 = vpop.eup %5144 }
0x1072   :  { %v3432_v11 = vadd.f32 %v3431_v6, %v3430_v16 }
0x1074   :  { %5146 = vtanh.f32 %v3432_v11 }
0x107e   :  { %v5147_v22 = vpop.eup %5146 }
0x107f   :  { %v3434_v23 = vmul.f32 %v5147_v22, %v5145_v12 }
0x1081   :  { %3703 = vmatmul.mubr.f32.vlgmr.msra.gmra.mrb[32].mxu0 %v3434_v23 }
0x1154   :  { %v3524_v39 = vpop.f32.mrb[32].mxu0 }
0x1155   :  { %v3525_v43 = vadd.f32 %v3652_v38, %v3524_v39  ;;  %v3704_v46 = vpop.f32.mrb[33].mxu0 }
0x1157   :  { %v3528_v58 = vmax.f32 %v3525_v43, 0.0 }
0x1159   :  { %v3529_v59 = vmul.f32 %v3528_v58, %v3528_v58 }
0x115b   :  { %v3531_v41 = vsel %vm3530_vm3, %v3529_v59, 0.0 }
0x115c   :  { %3532 = vadd.xlane.f32.xlu0 %v3531_v41 }
0x11e9   :  { %v3533_v60 = vpop.xlane.xlu0 %3532 }
0x11ea   :  { %v3534_v9 = vmax.f32 %v3533_v60, 1e-24 }
0x11ec   :  { %5148 = vrsqrt.f32 %v3534_v9 }
0x11f6   :  { %v5149_v51 = vpop.eup %5148 }
0x11f7   :  { %v3536_v21 = vmul.f32 %v5149_v51, %v3528_v58 }
0x11f9   :  { %3537 = vst.msk [vmem:[#allocation6] sm:$0xff] %vm3530_vm3, %v3536_v21 }
0x11fa   :  { %5183 = shalt.err (!%p5180_p12)
}
0x11fb   :  { %s5184_s26 = scalar_lea.hbm %s6268_s6, 128 }
0x11fc   :  { %p5185_p13 = scmp.ne.s32.totalorder %s6268_s6, %s5184_s26  ;;  %p5188_p0 = scmp.lt.u32.totalorder %s5184_s26, %s6268_s6 }
0x11fe   :  { %p5190_p1 = pnand %p5188_p0, %p5185_p13 }
0x1200   :  { %5193 = shalt.err (!%p5190_p1)
}
0x1201   :  { %3547 = dma.vmem_to_hbm [thread:$0]  %s3545_s23, 128, %s6268_s6, [#allocation5]  }
0x1202   :  { %5196 = dma.done.wait [#allocation5], 128  }
0x1203   :  { %5197 = vsyncadd [#allocation5], 4294967168 }
0x1204   :  { %3551 = vsyncpa [#allocation4], 1 }
0x1205   :  { %3552 = vsyncpa [#allocation5], 1 }

</bundles_post_ra>
